<compile_context>
chip_gen: v6e
topology: v6e:2x2x1
jax: 0.10.0
libtpu: 0.0.40
codegen_flags: <defaults>
</compile_context>

<pallas_src>
import jax
import jax.numpy as jnp
from jax.experimental import pallas as pl
from jax.experimental.pallas import tpu as pltpu

EPS = 1e-5


def _make_kernel(Wo, Pd, nb):
    # Tap schedule for the stride-2, pad-1, 3x3 conv under the parity-block
    # layout.  Output pixel (i, j) has center (2i, 2j); tap (dy, dx) reads
    # source pixel (2i+dy, 2j+dx) which lives in parity block
    # pb = 2*(dy != 0) + (dx != 0) at within-block position (i+a, j+b) with
    # a = -1 iff dy == -1 (else 0), b = -1 iff dx == -1.  A within-block shift
    # by (a, b) is a lane roll of the flattened (n, i, j) axis by
    # s = -(a*Wo + b), with a boundary mask zeroing the padded taps.
    taps = []
    for dy in (-1, 0, 1):
        for dx in (-1, 0, 1):
            pb = 2 * (1 if dy != 0 else 0) + (1 if dx != 0 else 0)
            a = -1 if dy == -1 else 0
            b = -1 if dx == -1 else 0
            s = -(a * Wo + b)                 # in {0, 1, Wo, Wo+1}
            mid = 2 * (a == -1) + (b == -1)   # boundary-mask id (0 = no mask)
            taps.append((pb, s, mid))

    def kernel(x_ref, w1_ref, w2_ref, w3_ref, wp_ref, msk_ref, seg_ref,
               segT_ref, g1_ref, b1_ref, g2_ref, b2_ref, g3_ref, b3_ref,
               gp_ref, bp_ref, o_ref):
        f32 = jnp.float32
        seg = seg_ref[...]       # (nb*Pd, nseg)  0/1 per-sample segment sums
        segT = segT_ref[...]     # (nseg, nb*Pd)  broadcast stats back to lanes
        msk = msk_ref[...]       # (4, nb*Pd)     boundary masks

        def coeffs(ssum, ssq, count, gamma, beta):
            # One-pass per-(channel, sample) instance-norm affine coefficients.
            mean = ssum * (1.0 / count)
            var = ssq * (1.0 / count) - mean * mean
            scale = gamma * jax.lax.rsqrt(var + EPS)          # (C, nseg)
            return scale, beta - mean * scale

        def seg_stats(t):
            ssum = jnp.dot(t, seg, preferred_element_type=f32)
            ssq = jnp.dot(t * t, seg, preferred_element_type=f32)
            return ssum, ssq

        def apply_affine(t, scale, shift):
            return (t * jnp.dot(scale, segT, preferred_element_type=f32)
                    + jnp.dot(shift, segT, preferred_element_type=f32))

        # ---- layer 1: 1x1 conv on all 4 parity blocks + norm + ReLU ---------
        w1 = w1_ref[...]                                   # (Cneck, Cin) bf16
        x_ee = x_ref[0]                                    # (Cin, nb*Pd) bf16
        y1 = []
        ssum = None
        ssq = None
        for pbk in range(4):
            xb = x_ee if pbk == 0 else x_ref[pbk]
            y = jnp.dot(w1, xb, preferred_element_type=f32)  # (Cneck, nb*Pd)
            y1.append(y)
            su, sq = seg_stats(y)
            ssum = su if ssum is None else ssum + su
            ssq = sq if ssq is None else ssq + sq
        scale, shift = coeffs(ssum, ssq, 4 * Pd, g1_ref[...], b1_ref[...])
        y1 = [jnp.maximum(apply_affine(y, scale, shift), 0.0) for y in y1]

        # ---- layer 2: 3x3 conv, stride 2, pad 1 + norm + ReLU ---------------
        slabs = []
        for pb, s, mid in taps:              # static Python unroll (9 taps)
            v = y1[pb]
            if s:
                v = jnp.roll(v, s, axis=1)
            if mid:
                v = v * msk[mid:mid + 1, :]
            slabs.append(v)
        z = jnp.concatenate(slabs, axis=0).astype(jnp.bfloat16)  # (9*Cneck, nb*Pd)
        s2 = jnp.dot(w2_ref[...], z, preferred_element_type=f32)  # (Cneck, nb*Pd)
        scale, shift = coeffs(*seg_stats(s2), Pd, g2_ref[...], b2_ref[...])
        y2 = jnp.maximum(apply_affine(s2, scale, shift), 0.0)

        # ---- layer 3: 1x1 conv + norm ---------------------------------------
        y3 = jnp.dot(w3_ref[...], y2.astype(jnp.bfloat16),
                     preferred_element_type=f32)            # (Cout, nb*Pd)
        scale, shift = coeffs(*seg_stats(y3), Pd, g3_ref[...], b3_ref[...])
        y3 = apply_affine(y3, scale, shift)

        # ---- projection: 1x1 conv, stride 2 (free slice) + norm -------------
        xp = jnp.dot(wp_ref[...], x_ee, preferred_element_type=f32)
        scale, shift = coeffs(*seg_stats(xp), Pd, gp_ref[...], bp_ref[...])
        xp = apply_affine(xp, scale, shift)

        o_ref[...] = (y3 + xp).astype(o_ref.dtype)

    return kernel


def _pick_nb(N, Cin, Cout, Pd, nb=None):
    """Per-grid-step sample count: nb | N; nb*Pd lane-dense (mult. of 128)
    unless nb == N; aim for >= ~1 MiB/step while staying well under the
    smallest VMEM (v7x, 64 MiB) with double buffering."""
    if nb is not None:
        assert N % nb == 0
        return nb
    cap_bytes = 8 << 20
    target_bytes = 1 << 20
    chosen = None
    for cand in range(1, N + 1):
        if N % cand:
            continue
        if (cand * Pd) % 128 != 0 and cand != N:
            continue
        step_bytes = cand * Pd * (2 * 4 * Cin + 4 * Cout)   # bf16 in + f32 out
        if chosen is not None and step_bytes > cap_bytes:
            break
        chosen = cand
        if step_bytes >= target_bytes:
            break
    return chosen if chosen is not None else N


def bottleneck_block(x_nchw, params, nb=None):
    """Forward of BottleNeckBlock_ins (in_channel != out_channel). NCHW in/out."""
    w1, w2, w3, wp, g1, b1, g2, b2, g3, b3, gp, bp = params
    N, Cin, H, W = x_nchw.shape
    assert H % 2 == 0 and W % 2 == 0, "parity-block stride-2 layout needs even H, W"
    Cneck = w1.shape[1]
    Cout = w3.shape[1]
    Ho, Wo = H // 2, W // 2
    Pd = Ho * Wo
    nb = _pick_nb(N, Cin, Cout, Pd, nb)
    L = nb * Pd
    nseg = -(-nb // 8) * 8          # pad sample axis of the stat matrices to >= 8

    # ---- wrapper-side layout plumbing (one XLA pass over x) ------------------
    blocks = [x_nchw[:, :, py::2, px::2] for py in (0, 1) for px in (0, 1)]
    xb = jnp.stack(blocks, axis=0)                        # (4, N, Cin, Ho, Wo)
    xb = jnp.transpose(xb, (0, 2, 1, 3, 4)).reshape(4, Cin, N * Pd)
    xb = xb.astype(jnp.bfloat16)                          # halve input HBM traffic

    # ---- one-time tiny weight re-layouts (bf16 MXU operands) -----------------
    bf16 = jnp.bfloat16
    w1t = jnp.transpose(w1).astype(bf16)                                 # (Cneck, Cin)
    w2f = jnp.transpose(w2, (3, 0, 1, 2)).reshape(Cneck, 9 * Cneck).astype(bf16)
    w3t = jnp.transpose(w3).astype(bf16)                                 # (Cout, Cneck)
    wpt = jnp.transpose(wp).astype(bf16)                                 # (Cout, Cin)
    gb = [a.reshape(-1, 1).astype(jnp.float32)
          for a in (g1, b1, g2, b2, g3, b3, gp, bp)]                     # (C, 1)

    # ---- per-lane constants: boundary masks + per-sample segment matrices ----
    lane = jnp.arange(L)
    i_idx = (lane % Pd) // Wo
    j_idx = lane % Wo
    ok_i = (i_idx > 0)
    ok_j = (j_idx > 0)
    msk = jnp.stack([jnp.ones((L,), jnp.float32),
                     ok_j.astype(jnp.float32),
                     ok_i.astype(jnp.float32),
                     (ok_i & ok_j).astype(jnp.float32)])                 # (4, L)
    seg = ((lane[:, None] // Pd) == jnp.arange(nseg)[None, :]).astype(jnp.float32)
    segT = jnp.transpose(seg)                                            # (nseg, L)

    weights = (w1t, w2f, w3t, wpt, msk, seg, segT, *gb)

    def full_spec(a):
        nd = a.ndim
        return pl.BlockSpec(a.shape, lambda n, _nd=nd: (0,) * _nd)

    flops = 2 * N * (Cneck * Cin * 4 * Pd + 9 * Cneck * Cneck * Pd
                     + Cout * Cneck * Pd + Cout * Cin * Pd)
    transcendentals = 2 * N * (Cneck + Cout)
    bytes_accessed = (xb.size * xb.dtype.itemsize + N * Cout * Pd * 4
                      + sum(int(a.size) * a.dtype.itemsize for a in weights))

    # Per-step VMEM residency: double-buffered in/out blocks + resident constants.
    step_bytes = 2 * (4 * Cin * L * 2 + Cout * L * 4)
    const_bytes = sum(int(a.size) * a.dtype.itemsize for a in weights)
    vmem_limit = int(min(48 << 20, max(16 << 20, 2 * (step_bytes + const_bytes))))

    out = pl.pallas_call(
        _make_kernel(Wo, Pd, nb),
        out_shape=jax.ShapeDtypeStruct((Cout, N * Pd), jnp.float32),
        grid_spec=pltpu.PrefetchScalarGridSpec(
            num_scalar_prefetch=0,
            grid=(N // nb,),
            in_specs=[pl.BlockSpec((4, Cin, L), lambda n: (0, 0, n))]
                     + [full_spec(a) for a in weights],
            out_specs=pl.BlockSpec((Cout, L), lambda n: (0, n)),
        ),
        compiler_params=pltpu.CompilerParams(
            dimension_semantics=("parallel",),      # batch blocks -> 2 TCs on v7x
            vmem_limit_bytes=vmem_limit),
        cost_estimate=pl.CostEstimate(flops=int(flops),
                                      transcendentals=int(transcendentals),
                                      bytes_accessed=int(bytes_accessed)),
    )(xb, *weights)

    # (Cout, N*Pd) -> (N, Cout, Ho, Wo): wrapper layout plumbing.
    return jnp.transpose(out.reshape(Cout, N, Ho, Wo), (1, 0, 2, 3))


def reference(x_nchw, params):
    """Pure-JAX reference with matching bf16-MXU-operand semantics."""
    w1, w2, w3, wp, g1, b1, g2, b2, g3, b3, gp, bp = params
    f32 = jnp.float32

    def b16(t):                    # model MXU bf16 operands, f32 accumulate
        return t.astype(jnp.bfloat16).astype(f32)

    x = jnp.transpose(x_nchw, (0, 2, 3, 1)).astype(f32)

    def norm(t, g, b):
        m = jnp.mean(t, axis=(1, 2), keepdims=True)
        v = jnp.mean((t - m) ** 2, axis=(1, 2), keepdims=True)
        return ((t - m) * jax.lax.rsqrt(v + EPS)
                * g.reshape(1, 1, 1, -1) + b.reshape(1, 1, 1, -1))

    y = jnp.einsum("nhwc,cd->nhwd", b16(x), b16(w1))
    y = jax.nn.relu(norm(y, g1, b1))
    y = jax.lax.conv_general_dilated(
        b16(y), b16(w2), window_strides=(2, 2), padding=((1, 1), (1, 1)),
        dimension_numbers=("NHWC", "HWIO", "NHWC"))
    y = jax.nn.relu(norm(y, g2, b2))
    y = jnp.einsum("nhwc,cd->nhwd", b16(y), b16(w3))
    y = norm(y, g3, b3)
    p = jnp.einsum("nhwc,cd->nhwd", b16(x[:, ::2, ::2, :]), b16(wp))
    p = norm(p, gp, bp)
    return jnp.transpose(y + p, (0, 3, 1, 2))


if __name__ == "__main__":
    N, Cin, Cout, H, W = 2, 8, 16, 16, 16
    neck_reduction = 4
    Cneck = Cout // neck_reduction

    key = jax.random.PRNGKey(0)
    ks = jax.random.split(key, 13)
    x = jax.random.normal(ks[0], (N, Cin, H, W), jnp.float32)

    w1 = jax.random.normal(ks[1], (Cin, Cneck), jnp.float32) / jnp.sqrt(Cin)
    w2 = jax.random.normal(ks[2], (3, 3, Cneck, Cneck), jnp.float32) / jnp.sqrt(9 * Cneck)
    w3 = jax.random.normal(ks[3], (Cneck, Cout), jnp.float32) / jnp.sqrt(Cneck)
    wp = jax.random.normal(ks[4], (Cin, Cout), jnp.float32) / jnp.sqrt(Cin)
    g1 = 1.0 + 0.1 * jax.random.normal(ks[5], (1, Cneck), jnp.float32)
    b1 = 0.1 * jax.random.normal(ks[6], (1, Cneck), jnp.float32)
    g2 = 1.0 + 0.1 * jax.random.normal(ks[7], (1, Cneck), jnp.float32)
    b2 = 0.1 * jax.random.normal(ks[8], (1, Cneck), jnp.float32)
    g3 = 1.0 + 0.1 * jax.random.normal(ks[9], (1, Cout), jnp.float32)
    b3 = 0.1 * jax.random.normal(ks[10], (1, Cout), jnp.float32)
    gp = 1.0 + 0.1 * jax.random.normal(ks[11], (1, Cout), jnp.float32)
    bp = 0.1 * jax.random.normal(ks[12], (1, Cout), jnp.float32)
    params = (w1, w2, w3, wp, g1, b1, g2, b2, g3, b3, gp, bp)

    out = jax.block_until_ready(bottleneck_block(x, params))
    ref = reference(x, params)

    assert out.shape == (N, Cout, H // 2, W // 2), out.shape
    max_err = float(jnp.max(jnp.abs(out - ref)))
    assert jnp.allclose(out, ref, atol=5e-3, rtol=5e-3), max_err
    print("KERNEL_OK")
</pallas_src>

<mosaic_0001>
module attributes {stable_mosaic.version = 11 : i64} {
  func.func @kernel(%arg0: i32, %arg1: memref<4x8x128xbf16, #tpu.memory_space<vmem>>, %arg2: memref<4x8xbf16, #tpu.memory_space<vmem>>, %arg3: memref<4x36xbf16, #tpu.memory_space<vmem>>, %arg4: memref<16x4xbf16, #tpu.memory_space<vmem>>, %arg5: memref<16x8xbf16, #tpu.memory_space<vmem>>, %arg6: memref<4x128xf32, #tpu.memory_space<vmem>>, %arg7: memref<128x8xf32, #tpu.memory_space<vmem>>, %arg8: memref<8x128xf32, #tpu.memory_space<vmem>>, %arg9: memref<4x1xf32, #tpu.memory_space<vmem>>, %arg10: memref<4x1xf32, #tpu.memory_space<vmem>>, %arg11: memref<4x1xf32, #tpu.memory_space<vmem>>, %arg12: memref<4x1xf32, #tpu.memory_space<vmem>>, %arg13: memref<16x1xf32, #tpu.memory_space<vmem>>, %arg14: memref<16x1xf32, #tpu.memory_space<vmem>>, %arg15: memref<16x1xf32, #tpu.memory_space<vmem>>, %arg16: memref<16x1xf32, #tpu.memory_space<vmem>>, %arg17: memref<16x128xf32, #tpu.memory_space<vmem>>) attributes {dimension_semantics = [#tpu.dimension_semantics<parallel>], iteration_bounds = array<i64: 1>, scalar_prefetch = 0 : i64, scratch_operands = 0 : i64, tpu.core_type = #tpu.core_type<tc>, window_params = [{transform_indices = @transform_0, window_bounds = array<i64: 4, 8, 128>}, {pipeline_mode = #tpu.pipeline_mode<synchronous>, transform_indices = @transform_1, window_bounds = array<i64: 4, 8>}, {pipeline_mode = #tpu.pipeline_mode<synchronous>, transform_indices = @transform_2, window_bounds = array<i64: 4, 36>}, {pipeline_mode = #tpu.pipeline_mode<synchronous>, transform_indices = @transform_3, window_bounds = array<i64: 16, 4>}, {pipeline_mode = #tpu.pipeline_mode<synchronous>, transform_indices = @transform_4, window_bounds = array<i64: 16, 8>}, {pipeline_mode = #tpu.pipeline_mode<synchronous>, transform_indices = @transform_5, window_bounds = array<i64: 4, 128>}, {pipeline_mode = #tpu.pipeline_mode<synchronous>, transform_indices = @transform_6, window_bounds = array<i64: 128, 8>}, {pipeline_mode = #tpu.pipeline_mode<synchronous>, transform_indices = @transform_7, window_bounds = array<i64: 8, 128>}, {pipeline_mode = #tpu.pipeline_mode<synchronous>, transform_indices = @transform_8, window_bounds = array<i64: 4, 1>}, {pipeline_mode = #tpu.pipeline_mode<synchronous>, transform_indices = @transform_9, window_bounds = array<i64: 4, 1>}, {pipeline_mode = #tpu.pipeline_mode<synchronous>, transform_indices = @transform_10, window_bounds = array<i64: 4, 1>}, {pipeline_mode = #tpu.pipeline_mode<synchronous>, transform_indices = @transform_11, window_bounds = array<i64: 4, 1>}, {pipeline_mode = #tpu.pipeline_mode<synchronous>, transform_indices = @transform_12, window_bounds = array<i64: 16, 1>}, {pipeline_mode = #tpu.pipeline_mode<synchronous>, transform_indices = @transform_13, window_bounds = array<i64: 16, 1>}, {pipeline_mode = #tpu.pipeline_mode<synchronous>, transform_indices = @transform_14, window_bounds = array<i64: 16, 1>}, {pipeline_mode = #tpu.pipeline_mode<synchronous>, transform_indices = @transform_15, window_bounds = array<i64: 16, 1>}, {transform_indices = @transform_16, window_bounds = array<i64: 16, 128>}]} {
    %c0 = arith.constant 0 : index
    %c0_0 = arith.constant 0 : index
    %0 = vector.load %arg7[%c0, %c0_0] : memref<128x8xf32, #tpu.memory_space<vmem>>, vector<128x8xf32>
    %c0_1 = arith.constant 0 : index
    %c0_2 = arith.constant 0 : index
    %1 = vector.load %arg8[%c0_1, %c0_2] : memref<8x128xf32, #tpu.memory_space<vmem>>, vector<8x128xf32>
    %c0_3 = arith.constant 0 : index
    %c0_4 = arith.constant 0 : index
    %2 = vector.load %arg6[%c0_3, %c0_4] : memref<4x128xf32, #tpu.memory_space<vmem>>, vector<4x128xf32>
    %c0_5 = arith.constant 0 : index
    %c0_6 = arith.constant 0 : index
    %3 = vector.load %arg2[%c0_5, %c0_6] : memref<4x8xbf16, #tpu.memory_space<vmem>>, vector<4x8xbf16>
    %c0_7 = arith.constant 0 : index
    %c0_8 = arith.constant 0 : index
    %c0_9 = arith.constant 0 : index
    %4 = vector.load %arg1[%c0_7, %c0_8, %c0_9] : memref<4x8x128xbf16, #tpu.memory_space<vmem>>, vector<1x8x128xbf16>
    %5 = vector.shape_cast %4 : vector<1x8x128xbf16> to vector<8x128xbf16>
    %cst = arith.constant dense<0.000000e+00> : vector<4x128xf32>
    %6 = tpu.matmul %3, %5, %cst {dimension_numbers = #tpu.dot_dimension_numbers<[1], [0], [0], [1], [0, 0, 1, 1], [], []>} : vector<4x8xbf16>, vector<8x128xbf16>, vector<4x128xf32> -> vector<4x128xf32>
    %cst_10 = arith.constant dense<0.000000e+00> : vector<4x8xf32>
    %7 = tpu.matmul %6, %0, %cst_10 {dimension_numbers = #tpu.dot_dimension_numbers<[1], [0], [0], [1], [0, 0, 1, 1], [], []>} : vector<4x128xf32>, vector<128x8xf32>, vector<4x8xf32> -> vector<4x8xf32>
    %8 = arith.mulf %6, %6 : vector<4x128xf32>
    %cst_11 = arith.constant dense<0.000000e+00> : vector<4x8xf32>
    %9 = tpu.matmul %8, %0, %cst_11 {dimension_numbers = #tpu.dot_dimension_numbers<[1], [0], [0], [1], [0, 0, 1, 1], [], []>} : vector<4x128xf32>, vector<128x8xf32>, vector<4x8xf32> -> vector<4x8xf32>
    %c1 = arith.constant 1 : index
    %c0_12 = arith.constant 0 : index
    %c0_13 = arith.constant 0 : index
    %10 = vector.load %arg1[%c1, %c0_12, %c0_13] : memref<4x8x128xbf16, #tpu.memory_space<vmem>>, vector<1x8x128xbf16>
    %11 = vector.shape_cast %10 : vector<1x8x128xbf16> to vector<8x128xbf16>
    %cst_14 = arith.constant dense<0.000000e+00> : vector<4x128xf32>
    %12 = tpu.matmul %3, %11, %cst_14 {dimension_numbers = #tpu.dot_dimension_numbers<[1], [0], [0], [1], [0, 0, 1, 1], [], []>} : vector<4x8xbf16>, vector<8x128xbf16>, vector<4x128xf32> -> vector<4x128xf32>
    %cst_15 = arith.constant dense<0.000000e+00> : vector<4x8xf32>
    %13 = tpu.matmul %12, %0, %cst_15 {dimension_numbers = #tpu.dot_dimension_numbers<[1], [0], [0], [1], [0, 0, 1, 1], [], []>} : vector<4x128xf32>, vector<128x8xf32>, vector<4x8xf32> -> vector<4x8xf32>
    %14 = arith.mulf %12, %12 : vector<4x128xf32>
    %cst_16 = arith.constant dense<0.000000e+00> : vector<4x8xf32>
    %15 = tpu.matmul %14, %0, %cst_16 {dimension_numbers = #tpu.dot_dimension_numbers<[1], [0], [0], [1], [0, 0, 1, 1], [], []>} : vector<4x128xf32>, vector<128x8xf32>, vector<4x8xf32> -> vector<4x8xf32>
    %16 = arith.addf %7, %13 : vector<4x8xf32>
    %17 = arith.addf %9, %15 : vector<4x8xf32>
    %c2 = arith.constant 2 : index
    %c0_17 = arith.constant 0 : index
    %c0_18 = arith.constant 0 : index
    %18 = vector.load %arg1[%c2, %c0_17, %c0_18] : memref<4x8x128xbf16, #tpu.memory_space<vmem>>, vector<1x8x128xbf16>
    %19 = vector.shape_cast %18 : vector<1x8x128xbf16> to vector<8x128xbf16>
    %cst_19 = arith.constant dense<0.000000e+00> : vector<4x128xf32>
    %20 = tpu.matmul %3, %19, %cst_19 {dimension_numbers = #tpu.dot_dimension_numbers<[1], [0], [0], [1], [0, 0, 1, 1], [], []>} : vector<4x8xbf16>, vector<8x128xbf16>, vector<4x128xf32> -> vector<4x128xf32>
    %cst_20 = arith.constant dense<0.000000e+00> : vector<4x8xf32>
    %21 = tpu.matmul %20, %0, %cst_20 {dimension_numbers = #tpu.dot_dimension_numbers<[1], [0], [0], [1], [0, 0, 1, 1], [], []>} : vector<4x128xf32>, vector<128x8xf32>, vector<4x8xf32> -> vector<4x8xf32>
    %22 = arith.mulf %20, %20 : vector<4x128xf32>
    %cst_21 = arith.constant dense<0.000000e+00> : vector<4x8xf32>
    %23 = tpu.matmul %22, %0, %cst_21 {dimension_numbers = #tpu.dot_dimension_numbers<[1], [0], [0], [1], [0, 0, 1, 1], [], []>} : vector<4x128xf32>, vector<128x8xf32>, vector<4x8xf32> -> vector<4x8xf32>
    %24 = arith.addf %16, %21 : vector<4x8xf32>
    %25 = arith.addf %17, %23 : vector<4x8xf32>
    %c3 = arith.constant 3 : index
    %c0_22 = arith.constant 0 : index
    %c0_23 = arith.constant 0 : index
    %26 = vector.load %arg1[%c3, %c0_22, %c0_23] : memref<4x8x128xbf16, #tpu.memory_space<vmem>>, vector<1x8x128xbf16>
    %27 = vector.shape_cast %26 : vector<1x8x128xbf16> to vector<8x128xbf16>
    %cst_24 = arith.constant dense<0.000000e+00> : vector<4x128xf32>
    %28 = tpu.matmul %3, %27, %cst_24 {dimension_numbers = #tpu.dot_dimension_numbers<[1], [0], [0], [1], [0, 0, 1, 1], [], []>} : vector<4x8xbf16>, vector<8x128xbf16>, vector<4x128xf32> -> vector<4x128xf32>
    %cst_25 = arith.constant dense<0.000000e+00> : vector<4x8xf32>
    %29 = tpu.matmul %28, %0, %cst_25 {dimension_numbers = #tpu.dot_dimension_numbers<[1], [0], [0], [1], [0, 0, 1, 1], [], []>} : vector<4x128xf32>, vector<128x8xf32>, vector<4x8xf32> -> vector<4x8xf32>
    %30 = arith.mulf %28, %28 : vector<4x128xf32>
    %cst_26 = arith.constant dense<0.000000e+00> : vector<4x8xf32>
    %31 = tpu.matmul %30, %0, %cst_26 {dimension_numbers = #tpu.dot_dimension_numbers<[1], [0], [0], [1], [0, 0, 1, 1], [], []>} : vector<4x128xf32>, vector<128x8xf32>, vector<4x8xf32> -> vector<4x8xf32>
    %32 = arith.addf %24, %29 : vector<4x8xf32>
    %33 = arith.addf %25, %31 : vector<4x8xf32>
    %c0_27 = arith.constant 0 : index
    %c0_28 = arith.constant 0 : index
    %34 = vector.load %arg9[%c0_27, %c0_28] : memref<4x1xf32, #tpu.memory_space<vmem>>, vector<4x1xf32>
    %c0_29 = arith.constant 0 : index
    %c0_30 = arith.constant 0 : index
    %35 = vector.load %arg10[%c0_29, %c0_30] : memref<4x1xf32, #tpu.memory_space<vmem>>, vector<4x1xf32>
    %cst_31 = arith.constant 3.906250e-03 : f32
    %36 = vector.broadcast %cst_31 : f32 to vector<4x8xf32>
    %37 = arith.mulf %32, %36 : vector<4x8xf32>
    %cst_32 = arith.constant 3.906250e-03 : f32
    %38 = vector.broadcast %cst_32 : f32 to vector<4x8xf32>
    %39 = arith.mulf %33, %38 : vector<4x8xf32>
    %40 = arith.mulf %37, %37 : vector<4x8xf32>
    %41 = arith.subf %39, %40 : vector<4x8xf32>
    %cst_33 = arith.constant 9.99999974E-6 : f32
    %42 = vector.broadcast %cst_33 : f32 to vector<4x8xf32>
    %43 = arith.addf %41, %42 : vector<4x8xf32>
    %44 = math.rsqrt %43 : vector<4x8xf32>
    %45 = vector.broadcast %34 : vector<4x1xf32> to vector<4x8xf32>
    %46 = arith.mulf %45, %44 : vector<4x8xf32>
    %47 = arith.mulf %37, %46 : vector<4x8xf32>
    %48 = vector.broadcast %35 : vector<4x1xf32> to vector<4x8xf32>
    %49 = arith.subf %48, %47 : vector<4x8xf32>
    %cst_34 = arith.constant dense<0.000000e+00> : vector<4x128xf32>
    %50 = tpu.matmul %46, %1, %cst_34 {dimension_numbers = #tpu.dot_dimension_numbers<[1], [0], [0], [1], [0, 0, 1, 1], [], []>} : vector<4x8xf32>, vector<8x128xf32>, vector<4x128xf32> -> vector<4x128xf32>
    %51 = arith.mulf %6, %50 : vector<4x128xf32>
    %cst_35 = arith.constant dense<0.000000e+00> : vector<4x128xf32>
    %52 = tpu.matmul %49, %1, %cst_35 {dimension_numbers = #tpu.dot_dimension_numbers<[1], [0], [0], [1], [0, 0, 1, 1], [], []>} : vector<4x8xf32>, vector<8x128xf32>, vector<4x128xf32> -> vector<4x128xf32>
    %53 = arith.addf %51, %52 : vector<4x128xf32>
    %cst_36 = arith.constant 0.000000e+00 : f32
    %54 = vector.broadcast %cst_36 : f32 to vector<4x128xf32>
    %55 = arith.maximumf %53, %54 : vector<4x128xf32>
    %cst_37 = arith.constant dense<0.000000e+00> : vector<4x128xf32>
    %56 = tpu.matmul %46, %1, %cst_37 {dimension_numbers = #tpu.dot_dimension_numbers<[1], [0], [0], [1], [0, 0, 1, 1], [], []>} : vector<4x8xf32>, vector<8x128xf32>, vector<4x128xf32> -> vector<4x128xf32>
    %57 = arith.mulf %12, %56 : vector<4x128xf32>
    %cst_38 = arith.constant dense<0.000000e+00> : vector<4x128xf32>
    %58 = tpu.matmul %49, %1, %cst_38 {dimension_numbers = #tpu.dot_dimension_numbers<[1], [0], [0], [1], [0, 0, 1, 1], [], []>} : vector<4x8xf32>, vector<8x128xf32>, vector<4x128xf32> -> vector<4x128xf32>
    %59 = arith.addf %57, %58 : vector<4x128xf32>
    %cst_39 = arith.constant 0.000000e+00 : f32
    %60 = vector.broadcast %cst_39 : f32 to vector<4x128xf32>
    %61 = arith.maximumf %59, %60 : vector<4x128xf32>
    %cst_40 = arith.constant dense<0.000000e+00> : vector<4x128xf32>
    %62 = tpu.matmul %46, %1, %cst_40 {dimension_numbers = #tpu.dot_dimension_numbers<[1], [0], [0], [1], [0, 0, 1, 1], [], []>} : vector<4x8xf32>, vector<8x128xf32>, vector<4x128xf32> -> vector<4x128xf32>
    %63 = arith.mulf %20, %62 : vector<4x128xf32>
    %cst_41 = arith.constant dense<0.000000e+00> : vector<4x128xf32>
    %64 = tpu.matmul %49, %1, %cst_41 {dimension_numbers = #tpu.dot_dimension_numbers<[1], [0], [0], [1], [0, 0, 1, 1], [], []>} : vector<4x8xf32>, vector<8x128xf32>, vector<4x128xf32> -> vector<4x128xf32>
    %65 = arith.addf %63, %64 : vector<4x128xf32>
    %cst_42 = arith.constant 0.000000e+00 : f32
    %66 = vector.broadcast %cst_42 : f32 to vector<4x128xf32>
    %67 = arith.maximumf %65, %66 : vector<4x128xf32>
    %cst_43 = arith.constant dense<0.000000e+00> : vector<4x128xf32>
    %68 = tpu.matmul %46, %1, %cst_43 {dimension_numbers = #tpu.dot_dimension_numbers<[1], [0], [0], [1], [0, 0, 1, 1], [], []>} : vector<4x8xf32>, vector<8x128xf32>, vector<4x128xf32> -> vector<4x128xf32>
    %69 = arith.mulf %28, %68 : vector<4x128xf32>
    %cst_44 = arith.constant dense<0.000000e+00> : vector<4x128xf32>
    %70 = tpu.matmul %49, %1, %cst_44 {dimension_numbers = #tpu.dot_dimension_numbers<[1], [0], [0], [1], [0, 0, 1, 1], [], []>} : vector<4x8xf32>, vector<8x128xf32>, vector<4x128xf32> -> vector<4x128xf32>
    %71 = arith.addf %69, %70 : vector<4x128xf32>
    %cst_45 = arith.constant 0.000000e+00 : f32
    %72 = vector.broadcast %cst_45 : f32 to vector<4x128xf32>
    %73 = arith.maximumf %71, %72 : vector<4x128xf32>
    %74 = vector.extract_strided_slice %73 {offsets = [0, 119], sizes = [4, 9], strides = [1, 1]} : vector<4x128xf32> to vector<4x9xf32>
    %75 = vector.extract_strided_slice %73 {offsets = [0, 0], sizes = [4, 119], strides = [1, 1]} : vector<4x128xf32> to vector<4x119xf32>
    %76 = tpu.concatenate %74, %75 in 1 : vector<4x9xf32>, vector<4x119xf32> -> vector<4x128xf32>
    %77 = vector.extract_strided_slice %2 {offsets = [3, 0], sizes = [1, 128], strides = [1, 1]} : vector<4x128xf32> to vector<1x128xf32>
    %78 = vector.broadcast %77 : vector<1x128xf32> to vector<4x128xf32>
    %79 = arith.mulf %76, %78 : vector<4x128xf32>
    %80 = vector.extract_strided_slice %67 {offsets = [0, 120], sizes = [4, 8], strides = [1, 1]} : vector<4x128xf32> to vector<4x8xf32>
    %81 = vector.extract_strided_slice %67 {offsets = [0, 0], sizes = [4, 120], strides = [1, 1]} : vector<4x128xf32> to vector<4x120xf32>
    %82 = tpu.concatenate %80, %81 in 1 : vector<4x8xf32>, vector<4x120xf32> -> vector<4x128xf32>
    %83 = vector.extract_strided_slice %2 {offsets = [2, 0], sizes = [1, 128], strides = [1, 1]} : vector<4x128xf32> to vector<1x128xf32>
    %84 = vector.broadcast %83 : vector<1x128xf32> to vector<4x128xf32>
    %85 = arith.mulf %82, %84 : vector<4x128xf32>
    %86 = vector.extract_strided_slice %73 {offsets = [0, 120], sizes = [4, 8], strides = [1, 1]} : vector<4x128xf32> to vector<4x8xf32>
    %87 = vector.extract_strided_slice %73 {offsets = [0, 0], sizes = [4, 120], strides = [1, 1]} : vector<4x128xf32> to vector<4x120xf32>
    %88 = tpu.concatenate %86, %87 in 1 : vector<4x8xf32>, vector<4x120xf32> -> vector<4x128xf32>
    %89 = vector.extract_strided_slice %2 {offsets = [2, 0], sizes = [1, 128], strides = [1, 1]} : vector<4x128xf32> to vector<1x128xf32>
    %90 = vector.broadcast %89 : vector<1x128xf32> to vector<4x128xf32>
    %91 = arith.mulf %88, %90 : vector<4x128xf32>
    %92 = vector.extract_strided_slice %61 {offsets = [0, 127], sizes = [4, 1], strides = [1, 1]} : vector<4x128xf32> to vector<4x1xf32>
    %93 = vector.extract_strided_slice %61 {offsets = [0, 0], sizes = [4, 127], strides = [1, 1]} : vector<4x128xf32> to vector<4x127xf32>
    %94 = tpu.concatenate %92, %93 in 1 : vector<4x1xf32>, vector<4x127xf32> -> vector<4x128xf32>
    %95 = vector.extract_strided_slice %2 {offsets = [1, 0], sizes = [1, 128], strides = [1, 1]} : vector<4x128xf32> to vector<1x128xf32>
    %96 = vector.broadcast %95 : vector<1x128xf32> to vector<4x128xf32>
    %97 = arith.mulf %94, %96 : vector<4x128xf32>
    %98 = vector.extract_strided_slice %73 {offsets = [0, 127], sizes = [4, 1], strides = [1, 1]} : vector<4x128xf32> to vector<4x1xf32>
    %99 = vector.extract_strided_slice %73 {offsets = [0, 0], sizes = [4, 127], strides = [1, 1]} : vector<4x128xf32> to vector<4x127xf32>
    %100 = tpu.concatenate %98, %99 in 1 : vector<4x1xf32>, vector<4x127xf32> -> vector<4x128xf32>
    %101 = vector.extract_strided_slice %2 {offsets = [1, 0], sizes = [1, 128], strides = [1, 1]} : vector<4x128xf32> to vector<1x128xf32>
    %102 = vector.broadcast %101 : vector<1x128xf32> to vector<4x128xf32>
    %103 = arith.mulf %100, %102 : vector<4x128xf32>
    %104 = tpu.concatenate %79, %85, %91, %97, %55, %61, %103, %67, %73 in 0 : vector<4x128xf32>, vector<4x128xf32>, vector<4x128xf32>, vector<4x128xf32>, vector<4x128xf32>, vector<4x128xf32>, vector<4x128xf32>, vector<4x128xf32>, vector<4x128xf32> -> vector<36x128xf32>
    %105 = arith.truncf %104 : vector<36x128xf32> to vector<36x128xbf16>
    %c0_46 = arith.constant 0 : index
    %c0_47 = arith.constant 0 : index
    %106 = vector.load %arg3[%c0_46, %c0_47] : memref<4x36xbf16, #tpu.memory_space<vmem>>, vector<4x36xbf16>
    %cst_48 = arith.constant dense<0.000000e+00> : vector<4x128xf32>
    %107 = tpu.matmul %106, %105, %cst_48 {dimension_numbers = #tpu.dot_dimension_numbers<[1], [0], [0], [1], [0, 0, 1, 1], [], []>} : vector<4x36xbf16>, vector<36x128xbf16>, vector<4x128xf32> -> vector<4x128xf32>
    %cst_49 = arith.constant dense<0.000000e+00> : vector<4x8xf32>
    %108 = tpu.matmul %107, %0, %cst_49 {dimension_numbers = #tpu.dot_dimension_numbers<[1], [0], [0], [1], [0, 0, 1, 1], [], []>} : vector<4x128xf32>, vector<128x8xf32>, vector<4x8xf32> -> vector<4x8xf32>
    %109 = arith.mulf %107, %107 : vector<4x128xf32>
    %cst_50 = arith.constant dense<0.000000e+00> : vector<4x8xf32>
    %110 = tpu.matmul %109, %0, %cst_50 {dimension_numbers = #tpu.dot_dimension_numbers<[1], [0], [0], [1], [0, 0, 1, 1], [], []>} : vector<4x128xf32>, vector<128x8xf32>, vector<4x8xf32> -> vector<4x8xf32>
    %c0_51 = arith.constant 0 : index
    %c0_52 = arith.constant 0 : index
    %111 = vector.load %arg11[%c0_51, %c0_52] : memref<4x1xf32, #tpu.memory_space<vmem>>, vector<4x1xf32>
    %c0_53 = arith.constant 0 : index
    %c0_54 = arith.constant 0 : index
    %112 = vector.load %arg12[%c0_53, %c0_54] : memref<4x1xf32, #tpu.memory_space<vmem>>, vector<4x1xf32>
    %cst_55 = arith.constant 1.562500e-02 : f32
    %113 = vector.broadcast %cst_55 : f32 to vector<4x8xf32>
    %114 = arith.mulf %108, %113 : vector<4x8xf32>
    %cst_56 = arith.constant 1.562500e-02 : f32
    %115 = vector.broadcast %cst_56 : f32 to vector<4x8xf32>
    %116 = arith.mulf %110, %115 : vector<4x8xf32>
    %117 = arith.mulf %114, %114 : vector<4x8xf32>
    %118 = arith.subf %116, %117 : vector<4x8xf32>
    %cst_57 = arith.constant 9.99999974E-6 : f32
    %119 = vector.broadcast %cst_57 : f32 to vector<4x8xf32>
    %120 = arith.addf %118, %119 : vector<4x8xf32>
    %121 = math.rsqrt %120 : vector<4x8xf32>
    %122 = vector.broadcast %111 : vector<4x1xf32> to vector<4x8xf32>
    %123 = arith.mulf %122, %121 : vector<4x8xf32>
    %124 = arith.mulf %114, %123 : vector<4x8xf32>
    %125 = vector.broadcast %112 : vector<4x1xf32> to vector<4x8xf32>
    %126 = arith.subf %125, %124 : vector<4x8xf32>
    %cst_58 = arith.constant dense<0.000000e+00> : vector<4x128xf32>
    %127 = tpu.matmul %123, %1, %cst_58 {dimension_numbers = #tpu.dot_dimension_numbers<[1], [0], [0], [1], [0, 0, 1, 1], [], []>} : vector<4x8xf32>, vector<8x128xf32>, vector<4x128xf32> -> vector<4x128xf32>
    %128 = arith.mulf %107, %127 : vector<4x128xf32>
    %cst_59 = arith.constant dense<0.000000e+00> : vector<4x128xf32>
    %129 = tpu.matmul %126, %1, %cst_59 {dimension_numbers = #tpu.dot_dimension_numbers<[1], [0], [0], [1], [0, 0, 1, 1], [], []>} : vector<4x8xf32>, vector<8x128xf32>, vector<4x128xf32> -> vector<4x128xf32>
    %130 = arith.addf %128, %129 : vector<4x128xf32>
    %cst_60 = arith.constant 0.000000e+00 : f32
    %131 = vector.broadcast %cst_60 : f32 to vector<4x128xf32>
    %132 = arith.maximumf %130, %131 : vector<4x128xf32>
    %c0_61 = arith.constant 0 : index
    %c0_62 = arith.constant 0 : index
    %133 = vector.load %arg4[%c0_61, %c0_62] : memref<16x4xbf16, #tpu.memory_space<vmem>>, vector<16x4xbf16>
    %134 = arith.truncf %132 : vector<4x128xf32> to vector<4x128xbf16>
    %cst_63 = arith.constant dense<0.000000e+00> : vector<16x128xf32>
    %135 = tpu.matmul %133, %134, %cst_63 {dimension_numbers = #tpu.dot_dimension_numbers<[1], [0], [0], [1], [0, 0, 1, 1], [], []>} : vector<16x4xbf16>, vector<4x128xbf16>, vector<16x128xf32> -> vector<16x128xf32>
    %cst_64 = arith.constant dense<0.000000e+00> : vector<16x8xf32>
    %136 = tpu.matmul %135, %0, %cst_64 {dimension_numbers = #tpu.dot_dimension_numbers<[1], [0], [0], [1], [0, 0, 1, 1], [], []>} : vector<16x128xf32>, vector<128x8xf32>, vector<16x8xf32> -> vector<16x8xf32>
    %137 = arith.mulf %135, %135 : vector<16x128xf32>
    %cst_65 = arith.constant dense<0.000000e+00> : vector<16x8xf32>
    %138 = tpu.matmul %137, %0, %cst_65 {dimension_numbers = #tpu.dot_dimension_numbers<[1], [0], [0], [1], [0, 0, 1, 1], [], []>} : vector<16x128xf32>, vector<128x8xf32>, vector<16x8xf32> -> vector<16x8xf32>
    %c0_66 = arith.constant 0 : index
    %c0_67 = arith.constant 0 : index
    %139 = vector.load %arg13[%c0_66, %c0_67] : memref<16x1xf32, #tpu.memory_space<vmem>>, vector<16x1xf32>
    %c0_68 = arith.constant 0 : index
    %c0_69 = arith.constant 0 : index
    %140 = vector.load %arg14[%c0_68, %c0_69] : memref<16x1xf32, #tpu.memory_space<vmem>>, vector<16x1xf32>
    %cst_70 = arith.constant 1.562500e-02 : f32
    %141 = vector.broadcast %cst_70 : f32 to vector<16x8xf32>
    %142 = arith.mulf %136, %141 : vector<16x8xf32>
    %cst_71 = arith.constant 1.562500e-02 : f32
    %143 = vector.broadcast %cst_71 : f32 to vector<16x8xf32>
    %144 = arith.mulf %138, %143 : vector<16x8xf32>
    %145 = arith.mulf %142, %142 : vector<16x8xf32>
    %146 = arith.subf %144, %145 : vector<16x8xf32>
    %cst_72 = arith.constant 9.99999974E-6 : f32
    %147 = vector.broadcast %cst_72 : f32 to vector<16x8xf32>
    %148 = arith.addf %146, %147 : vector<16x8xf32>
    %149 = math.rsqrt %148 : vector<16x8xf32>
    %150 = vector.broadcast %139 : vector<16x1xf32> to vector<16x8xf32>
    %151 = arith.mulf %150, %149 : vector<16x8xf32>
    %152 = arith.mulf %142, %151 : vector<16x8xf32>
    %153 = vector.broadcast %140 : vector<16x1xf32> to vector<16x8xf32>
    %154 = arith.subf %153, %152 : vector<16x8xf32>
    %cst_73 = arith.constant dense<0.000000e+00> : vector<16x128xf32>
    %155 = tpu.matmul %151, %1, %cst_73 {dimension_numbers = #tpu.dot_dimension_numbers<[1], [0], [0], [1], [0, 0, 1, 1], [], []>} : vector<16x8xf32>, vector<8x128xf32>, vector<16x128xf32> -> vector<16x128xf32>
    %156 = arith.mulf %135, %155 : vector<16x128xf32>
    %cst_74 = arith.constant dense<0.000000e+00> : vector<16x128xf32>
    %157 = tpu.matmul %154, %1, %cst_74 {dimension_numbers = #tpu.dot_dimension_numbers<[1], [0], [0], [1], [0, 0, 1, 1], [], []>} : vector<16x8xf32>, vector<8x128xf32>, vector<16x128xf32> -> vector<16x128xf32>
    %158 = arith.addf %156, %157 : vector<16x128xf32>
    %c0_75 = arith.constant 0 : index
    %c0_76 = arith.constant 0 : index
    %159 = vector.load %arg5[%c0_75, %c0_76] : memref<16x8xbf16, #tpu.memory_space<vmem>>, vector<16x8xbf16>
    %cst_77 = arith.constant dense<0.000000e+00> : vector<16x128xf32>
    %160 = tpu.matmul %159, %5, %cst_77 {dimension_numbers = #tpu.dot_dimension_numbers<[1], [0], [0], [1], [0, 0, 1, 1], [], []>} : vector<16x8xbf16>, vector<8x128xbf16>, vector<16x128xf32> -> vector<16x128xf32>
    %cst_78 = arith.constant dense<0.000000e+00> : vector<16x8xf32>
    %161 = tpu.matmul %160, %0, %cst_78 {dimension_numbers = #tpu.dot_dimension_numbers<[1], [0], [0], [1], [0, 0, 1, 1], [], []>} : vector<16x128xf32>, vector<128x8xf32>, vector<16x8xf32> -> vector<16x8xf32>
    %162 = arith.mulf %160, %160 : vector<16x128xf32>
    %cst_79 = arith.constant dense<0.000000e+00> : vector<16x8xf32>
    %163 = tpu.matmul %162, %0, %cst_79 {dimension_numbers = #tpu.dot_dimension_numbers<[1], [0], [0], [1], [0, 0, 1, 1], [], []>} : vector<16x128xf32>, vector<128x8xf32>, vector<16x8xf32> -> vector<16x8xf32>
    %c0_80 = arith.constant 0 : index
    %c0_81 = arith.constant 0 : index
    %164 = vector.load %arg15[%c0_80, %c0_81] : memref<16x1xf32, #tpu.memory_space<vmem>>, vector<16x1xf32>
    %c0_82 = arith.constant 0 : index
    %c0_83 = arith.constant 0 : index
    %165 = vector.load %arg16[%c0_82, %c0_83] : memref<16x1xf32, #tpu.memory_space<vmem>>, vector<16x1xf32>
    %cst_84 = arith.constant 1.562500e-02 : f32
    %166 = vector.broadcast %cst_84 : f32 to vector<16x8xf32>
    %167 = arith.mulf %161, %166 : vector<16x8xf32>
    %cst_85 = arith.constant 1.562500e-02 : f32
    %168 = vector.broadcast %cst_85 : f32 to vector<16x8xf32>
    %169 = arith.mulf %163, %168 : vector<16x8xf32>
    %170 = arith.mulf %167, %167 : vector<16x8xf32>
    %171 = arith.subf %169, %170 : vector<16x8xf32>
    %cst_86 = arith.constant 9.99999974E-6 : f32
    %172 = vector.broadcast %cst_86 : f32 to vector<16x8xf32>
    %173 = arith.addf %171, %172 : vector<16x8xf32>
    %174 = math.rsqrt %173 : vector<16x8xf32>
    %175 = vector.broadcast %164 : vector<16x1xf32> to vector<16x8xf32>
    %176 = arith.mulf %175, %174 : vector<16x8xf32>
    %177 = arith.mulf %167, %176 : vector<16x8xf32>
    %178 = vector.broadcast %165 : vector<16x1xf32> to vector<16x8xf32>
    %179 = arith.subf %178, %177 : vector<16x8xf32>
    %cst_87 = arith.constant dense<0.000000e+00> : vector<16x128xf32>
    %180 = tpu.matmul %176, %1, %cst_87 {dimension_numbers = #tpu.dot_dimension_numbers<[1], [0], [0], [1], [0, 0, 1, 1], [], []>} : vector<16x8xf32>, vector<8x128xf32>, vector<16x128xf32> -> vector<16x128xf32>
    %181 = arith.mulf %160, %180 : vector<16x128xf32>
    %cst_88 = arith.constant dense<0.000000e+00> : vector<16x128xf32>
    %182 = tpu.matmul %179, %1, %cst_88 {dimension_numbers = #tpu.dot_dimension_numbers<[1], [0], [0], [1], [0, 0, 1, 1], [], []>} : vector<16x8xf32>, vector<8x128xf32>, vector<16x128xf32> -> vector<16x128xf32>
    %183 = arith.addf %181, %182 : vector<16x128xf32>
    %184 = arith.addf %158, %183 : vector<16x128xf32>
    %c0_89 = arith.constant 0 : index
    %c0_90 = arith.constant 0 : index
    %185 = vector.load %arg17[%c0_89, %c0_90] : memref<16x128xf32, #tpu.memory_space<vmem>>, vector<16x128xf32>
    tpu.vector_store %arg17[%c0_89, %c0_90], %184 {strides = array<i32>} : memref<16x128xf32, #tpu.memory_space<vmem>>, vector<16x128xf32>,
    return
  }
  func.func @transform_0(%arg0: i32) -> (i32, i32, i32) {
    %c0_i32 = arith.constant 0 : i32
    %c0_i32_0 = arith.constant 0 : i32
    %c0_i32_1 = arith.constant 0 : i32
    return %c0_i32, %c0_i32_0, %arg0 : i32, i32, i32
  }
  func.func @transform_1(%arg0: i32) -> (i32, i32) {
    %c0_i32 = arith.constant 0 : i32
    %c0_i32_0 = arith.constant 0 : i32
    %c0_i32_1 = arith.constant 0 : i32
    return %c0_i32, %c0_i32_0 : i32, i32
  }
  func.func @transform_2(%arg0: i32) -> (i32, i32) {
    %c0_i32 = arith.constant 0 : i32
    %c0_i32_0 = arith.constant 0 : i32
    %c0_i32_1 = arith.constant 0 : i32
    return %c0_i32, %c0_i32_0 : i32, i32
  }
  func.func @transform_3(%arg0: i32) -> (i32, i32) {
    %c0_i32 = arith.constant 0 : i32
    %c0_i32_0 = arith.constant 0 : i32
    %c0_i32_1 = arith.constant 0 : i32
    return %c0_i32, %c0_i32_0 : i32, i32
  }
  func.func @transform_4(%arg0: i32) -> (i32, i32) {
    %c0_i32 = arith.constant 0 : i32
    %c0_i32_0 = arith.constant 0 : i32
    %c0_i32_1 = arith.constant 0 : i32
    return %c0_i32, %c0_i32_0 : i32, i32
  }
  func.func @transform_5(%arg0: i32) -> (i32, i32) {
    %c0_i32 = arith.constant 0 : i32
    %c0_i32_0 = arith.constant 0 : i32
    %c0_i32_1 = arith.constant 0 : i32
    return %c0_i32, %c0_i32_0 : i32, i32
  }
  func.func @transform_6(%arg0: i32) -> (i32, i32) {
    %c0_i32 = arith.constant 0 : i32
    %c0_i32_0 = arith.constant 0 : i32
    %c0_i32_1 = arith.constant 0 : i32
    return %c0_i32, %c0_i32_0 : i32, i32
  }
  func.func @transform_7(%arg0: i32) -> (i32, i32) {
    %c0_i32 = arith.constant 0 : i32
    %c0_i32_0 = arith.constant 0 : i32
    %c0_i32_1 = arith.constant 0 : i32
    return %c0_i32, %c0_i32_0 : i32, i32
  }
  func.func @transform_8(%arg0: i32) -> (i32, i32) {
    %c0_i32 = arith.constant 0 : i32
    %c0_i32_0 = arith.constant 0 : i32
    %c0_i32_1 = arith.constant 0 : i32
    return %c0_i32, %c0_i32_0 : i32, i32
  }
  func.func @transform_9(%arg0: i32) -> (i32, i32) {
    %c0_i32 = arith.constant 0 : i32
    %c0_i32_0 = arith.constant 0 : i32
    %c0_i32_1 = arith.constant 0 : i32
    return %c0_i32, %c0_i32_0 : i32, i32
  }
  func.func @transform_10(%arg0: i32) -> (i32, i32) {
    %c0_i32 = arith.constant 0 : i32
    %c0_i32_0 = arith.constant 0 : i32
    %c0_i32_1 = arith.constant 0 : i32
    return %c0_i32, %c0_i32_0 : i32, i32
  }
  func.func @transform_11(%arg0: i32) -> (i32, i32) {
    %c0_i32 = arith.constant 0 : i32
    %c0_i32_0 = arith.constant 0 : i32
    %c0_i32_1 = arith.constant 0 : i32
    return %c0_i32, %c0_i32_0 : i32, i32
  }
  func.func @transform_12(%arg0: i32) -> (i32, i32) {
    %c0_i32 = arith.constant 0 : i32
    %c0_i32_0 = arith.constant 0 : i32
    %c0_i32_1 = arith.constant 0 : i32
    return %c0_i32, %c0_i32_0 : i32, i32
  }
  func.func @transform_13(%arg0: i32) -> (i32, i32) {
    %c0_i32 = arith.constant 0 : i32
    %c0_i32_0 = arith.constant 0 : i32
    %c0_i32_1 = arith.constant 0 : i32
    return %c0_i32, %c0_i32_0 : i32, i32
  }
  func.func @transform_14(%arg0: i32) -> (i32, i32) {
    %c0_i32 = arith.constant 0 : i32
    %c0_i32_0 = arith.constant 0 : i32
    %c0_i32_1 = arith.constant 0 : i32
    return %c0_i32, %c0_i32_0 : i32, i32
  }
  func.func @transform_15(%arg0: i32) -> (i32, i32) {
    %c0_i32 = arith.constant 0 : i32
    %c0_i32_0 = arith.constant 0 : i32
    %c0_i32_1 = arith.constant 0 : i32
    return %c0_i32, %c0_i32_0 : i32, i32
  }
  func.func @transform_16(%arg0: i32) -> (i32, i32) {
    %c0_i32 = arith.constant 0 : i32
    %c0_i32_0 = arith.constant 0 : i32
    return %c0_i32, %arg0 : i32, i32
  }
}

</mosaic_0001>

<bundles_post_ra>
// kernel: tpu_custom_call.1
= control target key start
LH: loop header
LB: loop body
LE: loop exit
PB: predicated region body
PF: predicated region fallthrough
CT: control target
= control target key end

     0   :  { %s4131_s0 = inlined_call_operand.vmem [shape: bf16[4,8,128], index: 0, kind: input, shape index: {}]   ;;  %s4132_s1 = inlined_call_operand.vmem [shape: bf16[4,8], index: 1, kind: input, shape index: {}]   ;;  %s4133_s2 = inlined_call_operand.vmem [shape: bf16[4,36], index: 2, kind: input, shape index: {}]   ;;  %s4134_s3 = inlined_call_operand.vmem [shape: bf16[16,4], index: 3, kind: input, shape index: {}]   ;;  %s4135_s4 = inlined_call_operand.vmem [shape: bf16[16,8], index: 4, kind: input, shape index: {}]   ;;  %s4136_s5 = inlined_call_operand.vmem [shape: f32[4,128], index: 5, kind: input, shape index: {}]   ;;  %s4137_s6 = inlined_call_operand.vmem [shape: f32[128,8], index: 6, kind: input, shape index: {}]   ;;  %s4138_s7 = inlined_call_operand.vmem [shape: f32[8,128], index: 7, kind: input, shape index: {}]   ;;  %s4139_s8 = inlined_call_operand.vmem [shape: f32[4,1], index: 8, kind: input, shape index: {}]   ;;  %s4140_s9 = inlined_call_operand.vmem [shape: f32[4,1], index: 9, kind: input, shape index: {}]   ;;  %s4141_s10 = inlined_call_operand.vmem [shape: f32[4,1], index: 10, kind: input, shape index: {}]   ;;  %s4142_s11 = inlined_call_operand.vmem [shape: f32[4,1], index: 11, kind: input, shape index: {}]   ;;  %s4143_s12 = inlined_call_operand.vmem [shape: f32[16,1], index: 12, kind: input, shape index: {}]   ;;  %s4144_s13 = inlined_call_operand.vmem [shape: f32[16,1], index: 13, kind: input, shape index: {}]   ;;  %s4145_s14 = inlined_call_operand.vmem [shape: f32[16,1], index: 14, kind: input, shape index: {}]   ;;  %s4146_s15 = inlined_call_operand.vmem [shape: f32[16,1], index: 15, kind: input, shape index: {}]   ;;  %s4147_s16 = inlined_call_operand.hbm [shape: f32[16,128], index: 16, kind: output, shape index: {}]  }
   0x1   :  { %4149 = sst [smem:[#allocation5_spill]] %s4131_s0 }
   0x2   :  { %vm79_vm0 = vcmask 1043456   ;;  %s4150_s23 = sld [smem:[#allocation5_spill]]  ;;  %v3204_v1 = vmov 0.0   ;;  %vm3205_vm1 = vmmov 0   ;;  %v3310_v4 = vld [vmem:[%s4132_s1] sm:$0x3] }
   0x3   :  { %2572 = vmatprep.subr.bf16.mxu1 %v3204_v1  ;;  %2574 = vmatprep.mubr.msk.bf16.mxu1 %vm3205_vm1, %v3204_v1  ;;  %vm75_vm2 = vcmask 64512   ;;  %v3323_v6 = vld [vmem:[%s4137_s6 + $0x78] sm:$0xff]  ;;  %v3333_v7 = vld [vmem:[%s4137_s6 + $0x70] sm:$0xff]  ;;  %v3342_v8 = vld [vmem:[%s4137_s6 + $0x68] sm:$0xff] }
   0x4   :  { %2566 = vmatprep.subr.bf16.mxu0 %v3204_v1  ;;  %2568 = vmatprep.mubr.msk.bf16.mxu0 %vm3205_vm1, %v3204_v1 }
   0x8   :  { %v2265_v0 = vld [vmem:[%s4150_s23 + $0x4] sm:$0xf]  ;;  %v74_v3 = vld [vmem:[%s4150_s23] sm:$0xf] }
   0x9   :  { %v127_v2 = vsel %vm79_vm0, %v2265_v0, 0  ;;  %v3314_v5 = vsel %vm79_vm0, %v74_v3, 0 }
   0xa   :  { %2573 = vmatpush3.bf16.msra.mxu1 %v127_v2  ;;  %2567 = vmatpush3.bf16.msra.mxu0 %v3314_v5 }
   0xb   :  { %2578 = vmatprep.subr.mxu0 %v3204_v1  ;;  %2613 = vmatprep.subr.mxu1 %v3204_v1 }
   0xd   :  { %2575 = vmatmul.mubr.msk.bf16.vlgmr.msra.gmra.mxu1 %vm75_vm2, %v3310_v4  ;;  %2569 = vmatmul.mubr.msk.bf16.vlgmr.msra.gmra.mxu0 %vm75_vm2, %v3310_v4 }
   0xe   :  { %2614 = vmatpush3.msra.mxu1 %v3323_v6  ;;  %2579 = vmatpush3.msra.mxu0 %v3323_v6 }
   0xf   :  { %2615 = vmatprep.subr.mxu1 %v3204_v1  ;;  %2580 = vmatprep.subr.mxu0 %v3204_v1 }
  0x10   :  { %2616 = vmatpush3.msra.mxu1 %v3333_v7 }
  0x11   :  { %21 = vsyncpa [#allocation3], 0  ;;  %2581 = vmatpush3.msra.mxu0 %v3333_v7  ;;  %2617 = vmatprep.subr.mxu1 %v3204_v1  ;;  %v3351_v9 = vld [vmem:[%s4137_s6 + $0x60] sm:$0xff]  ;;  %v3360_v10 = vld [vmem:[%s4137_s6 + $0x58] sm:$0xff]  ;;  %v3206_v52 = vmov 0   ;;  %vm1062_vm3 = vcmask 1041408  }
  0x12   :  { %2582 = vmatprep.subr.mxu0 %v3204_v1  ;;  %2618 = vmatpush3.msra.mxu1 %v3342_v8  ;;  %v3369_v11 = vld [vmem:[%s4137_s6 + $0x50] sm:$0xff]  ;;  %v3378_v12 = vld [vmem:[%s4137_s6 + $0x48] sm:$0xff]  ;;  %v3387_v13 = vld [vmem:[%s4137_s6 + $0x40] sm:$0xff]  ;;  %s3208_s21 = smov 8   ;;  %s3209_s25 = smov 9   ;;  %vm1058_vm4 = vcmask 293888  }
  0x13   :  { %2583 = vmatpush3.msra.mxu0 %v3342_v8  ;;  %2619 = vmatprep.subr.mxu1 %v3204_v1  ;;  %v3396_v14 = vld [vmem:[%s4137_s6 + $0x38] sm:$0xff]  ;;  %v3405_v15 = vld [vmem:[%s4137_s6 + $0x30] sm:$0xff]  ;;  %v3414_v16 = vld [vmem:[%s4137_s6 + $0x28] sm:$0xff]  ;;  %vm1425_vm5 = vcmask 31744  }
  0x14   :  { %2584 = vmatprep.subr.mxu0 %v3204_v1  ;;  %2620 = vmatpush3.msra.mxu1 %v3351_v9  ;;  %v3423_v17 = vld [vmem:[%s4137_s6 + $0x20] sm:$0xff]  ;;  %v3432_v18 = vld [vmem:[%s4137_s6 + $0x18] sm:$0xff]  ;;  %v3441_v19 = vld [vmem:[%s4137_s6 + $0x10] sm:$0xff] }
  0x15   :  { %2585 = vmatpush3.msra.mxu0 %v3351_v9  ;;  %2621 = vmatprep.subr.mxu1 %v3204_v1  ;;  %v3450_v20 = vld [vmem:[%s4137_s6 + $0x8] sm:$0xff]  ;;  %v3459_v21 = vld [vmem:[%s4137_s6] sm:$0xff] }
  0x16   :  { %2586 = vmatprep.subr.mxu0 %v3204_v1  ;;  %2622 = vmatpush3.msra.mxu1 %v3360_v10  ;;  %v2267_v31 = vld [vmem:[%s4150_s23 + $0x8] sm:$0xf]  ;;  %v2269_v40 = vld [vmem:[%s4150_s23 + $0xc] sm:$0xf]  ;;  %v826_v51 = vld [vmem:[%s4139_s8] sm:$0xf] }
  0x17   :  { %2587 = vmatpush3.msra.mxu0 %v3360_v10  ;;  %2623 = vmatprep.subr.mxu1 %v3204_v1  ;;  %v453_v33 = vsel %vm79_vm0, %v2267_v31, 0  ;;  %v641_v44 = vsel %vm79_vm0, %v2269_v40, 0  ;;  %v827_v53 = vld [vmem:[%s4140_s9] sm:$0xf] }
  0x18   :  { %2588 = vmatprep.subr.mxu0 %v3204_v1  ;;  %2624 = vmatpush3.msra.mxu1 %v3369_v11  ;;  %v3734_v2 = vld [vmem:[%s4138_s7] sm:$0xff]  ;;  %s3207_s7 = smov 1  }
  0x19   :  { %2589 = vmatpush3.msra.mxu0 %v3369_v11  ;;  %2625 = vmatprep.subr.mxu1 %v3204_v1 }
  0x1a   :  { %2590 = vmatprep.subr.mxu0 %v3204_v1  ;;  %2626 = vmatpush3.msra.mxu1 %v3378_v12 }
  0x1b   :  { %2591 = vmatpush3.msra.mxu0 %v3378_v12  ;;  %2627 = vmatprep.subr.mxu1 %v3204_v1 }
  0x1c   :  { %2592 = vmatprep.subr.mxu0 %v3204_v1  ;;  %2628 = vmatpush3.msra.mxu1 %v3387_v13 }
  0x1d   :  { %2593 = vmatpush3.msra.mxu0 %v3387_v13  ;;  %2629 = vmatprep.subr.mxu1 %v3204_v1 }
  0x1e   :  { %2594 = vmatprep.subr.mxu0 %v3204_v1  ;;  %2630 = vmatpush3.msra.mxu1 %v3396_v14 }
  0x1f   :  { %2595 = vmatpush3.msra.mxu0 %v3396_v14  ;;  %2631 = vmatprep.subr.mxu1 %v3204_v1 }
  0x20   :  { %2596 = vmatprep.subr.mxu0 %v3204_v1  ;;  %2632 = vmatpush3.msra.mxu1 %v3405_v15 }
  0x21   :  { %2597 = vmatpush3.msra.mxu0 %v3405_v15  ;;  %2633 = vmatprep.subr.mxu1 %v3204_v1 }
  0x22   :  { %2598 = vmatprep.subr.mxu0 %v3204_v1  ;;  %2634 = vmatpush3.msra.mxu1 %v3414_v16 }
  0x23   :  { %2599 = vmatpush3.msra.mxu0 %v3414_v16  ;;  %2635 = vmatprep.subr.mxu1 %v3204_v1 }
  0x24   :  { %2600 = vmatprep.subr.mxu0 %v3204_v1  ;;  %2636 = vmatpush3.msra.mxu1 %v3423_v17 }
  0x25   :  { %2601 = vmatpush3.msra.mxu0 %v3423_v17  ;;  %2637 = vmatprep.subr.mxu1 %v3204_v1 }
  0x26   :  { %2602 = vmatprep.subr.mxu0 %v3204_v1  ;;  %2638 = vmatpush3.msra.mxu1 %v3432_v18 }
  0x27   :  { %2603 = vmatpush3.msra.mxu0 %v3432_v18  ;;  %2639 = vmatprep.subr.mxu1 %v3204_v1 }
  0x28   :  { %2604 = vmatprep.subr.mxu0 %v3204_v1  ;;  %2640 = vmatpush3.msra.mxu1 %v3441_v19 }
  0x29   :  { %2605 = vmatpush3.msra.mxu0 %v3441_v19  ;;  %2641 = vmatprep.subr.mxu1 %v3204_v1 }
  0x2a   :  { %2606 = vmatprep.subr.mxu0 %v3204_v1  ;;  %2642 = vmatpush3.msra.mxu1 %v3450_v20 }
  0x2b   :  { %2607 = vmatpush3.msra.mxu0 %v3450_v20  ;;  %2610 = vmatprep.mubr.msk.f32.mxu0 %vm3205_vm1, %v3204_v1 }
  0x2c   :  { %2608 = vmatprep.subr.mxu0 %v3204_v1  ;;  %2643 = vmatprep.subr.mxu1 %v3204_v1 }
  0x2d   :  { %2609 = vmatpush3.msra.mxu0 %v3459_v21  ;;  %2644 = vmatpush3.msra.mxu1 %v3459_v21 }
  0x2e   :  { %2648 = vmatprep.subr.mxu0 %v3204_v1  ;;  %2645 = vmatprep.mubr.msk.f32.mxu1 %vm3205_vm1, %v3204_v1 }
  0x2f   :  { %2683 = vmatprep.subr.mxu1 %v3204_v1  ;;  %3150 = vset.pattern.permute.xlu0 %v3206_v52 }
  0x30   :  { %3151 = vset.pattern.permute.xlu1 %v3206_v52  ;;  %836 = vperm.xlu0 %3150, %v826_v51  }
  0x34   :  { %843 = vperm.xlu0 %3150, %v827_v53  }
  0xcd   :  { %v3473_v22 = vpop.f32.mrf.mxu1  ;;  %v3478_v24 = vpop.f32.mrf.mxu0 }
  0xce   :  { %v239_v23 = vmul.f32 %v3473_v22, %v3473_v22  ;;  %2611 = vmatmul.mubr.f32.vlgmr.msra.gmra.mxu0 %v3473_v22  ;;  %v123_v32 = vmul.f32 %v3478_v24, %v3478_v24 }
  0xcf   :  { %2649 = vmatpush3.msra.mxu0 %v3323_v6  ;;  %v2576_v25 = vpop.f32.mrf.mxu1  ;;  %2680 = vmatprep.mubr.msk.f32.mxu0 %vm3205_vm1, %v3204_v1  ;;  %v2570_v26 = vpop.f32.mrf.mxu0 }
  0xd0   :  { %2650 = vmatprep.subr.mxu0 %v3204_v1  ;;  %2646 = vmatmul.mubr.f32.vlgmr.msra.gmra.mxu1 %v239_v23 }
  0xd1   :  { %2651 = vmatpush3.msra.mxu0 %v3333_v7  ;;  %2684 = vmatpush3.msra.mxu1 %v3323_v6  ;;  %v166_v27 = vpop.f32.mrf.mxu1  ;;  %v120_v28 = vpop.f32.mrf.mxu0 }
  0xd2   :  { %2652 = vmatprep.subr.mxu0 %v3204_v1  ;;  %2685 = vmatprep.subr.mxu1 %v3204_v1 }
  0xd3   :  { %2653 = vmatpush3.msra.mxu0 %v3342_v8  ;;  %2686 = vmatpush3.msra.mxu1 %v3333_v7  ;;  %v2577_v29 = vpop.f32.mrf.mxu1  ;;  %v2571_v30 = vpop.f32.mrf.mxu0 }
  0xd4   :  { %2654 = vmatprep.subr.mxu0 %v3204_v1  ;;  %2687 = vmatprep.subr.mxu1 %v3204_v1 }
  0xd5   :  { %2655 = vmatpush3.msra.mxu0 %v3351_v9  ;;  %2688 = vmatpush3.msra.mxu1 %v3342_v8 }
  0xd6   :  { %2656 = vmatprep.subr.mxu0 %v3204_v1  ;;  %2689 = vmatprep.subr.mxu1 %v3204_v1 }
  0xd7   :  { %2657 = vmatpush3.msra.mxu0 %v3360_v10  ;;  %2690 = vmatpush3.msra.mxu1 %v3351_v9 }
  0xd8   :  { %2658 = vmatprep.subr.mxu0 %v3204_v1  ;;  %2691 = vmatprep.subr.mxu1 %v3204_v1 }
  0xd9   :  { %2659 = vmatpush3.msra.mxu0 %v3369_v11  ;;  %2692 = vmatpush3.msra.mxu1 %v3360_v10 }
  0xda   :  { %2660 = vmatprep.subr.mxu0 %v3204_v1  ;;  %2693 = vmatprep.subr.mxu1 %v3204_v1 }
  0xdb   :  { %2661 = vmatpush3.msra.mxu0 %v3378_v12  ;;  %2694 = vmatpush3.msra.mxu1 %v3369_v11 }
  0xdc   :  { %2662 = vmatprep.subr.mxu0 %v3204_v1  ;;  %2695 = vmatprep.subr.mxu1 %v3204_v1 }
  0xdd   :  { %2663 = vmatpush3.msra.mxu0 %v3387_v13  ;;  %2696 = vmatpush3.msra.mxu1 %v3378_v12 }
  0xde   :  { %2664 = vmatprep.subr.mxu0 %v3204_v1  ;;  %2697 = vmatprep.subr.mxu1 %v3204_v1 }
  0xdf   :  { %2665 = vmatpush3.msra.mxu0 %v3396_v14  ;;  %2698 = vmatpush3.msra.mxu1 %v3387_v13 }
  0xe0   :  { %2666 = vmatprep.subr.mxu0 %v3204_v1  ;;  %2699 = vmatprep.subr.mxu1 %v3204_v1 }
  0xe1   :  { %2667 = vmatpush3.msra.mxu0 %v3405_v15  ;;  %2700 = vmatpush3.msra.mxu1 %v3396_v14 }
  0xe2   :  { %2668 = vmatprep.subr.mxu0 %v3204_v1  ;;  %2701 = vmatprep.subr.mxu1 %v3204_v1 }
  0xe3   :  { %2669 = vmatpush3.msra.mxu0 %v3414_v16  ;;  %2702 = vmatpush3.msra.mxu1 %v3405_v15 }
  0xe4   :  { %2670 = vmatprep.subr.mxu0 %v3204_v1  ;;  %2703 = vmatprep.subr.mxu1 %v3204_v1 }
  0xe5   :  { %2671 = vmatpush3.msra.mxu0 %v3423_v17  ;;  %2704 = vmatpush3.msra.mxu1 %v3414_v16 }
  0xe6   :  { %2672 = vmatprep.subr.mxu0 %v3204_v1  ;;  %2705 = vmatprep.subr.mxu1 %v3204_v1 }
  0xe7   :  { %2673 = vmatpush3.msra.mxu0 %v3432_v18  ;;  %2706 = vmatpush3.msra.mxu1 %v3423_v17 }
  0xe8   :  { %2674 = vmatprep.subr.mxu0 %v3204_v1  ;;  %2707 = vmatprep.subr.mxu1 %v3204_v1 }
  0xe9   :  { %2675 = vmatpush3.msra.mxu0 %v3441_v19  ;;  %2708 = vmatpush3.msra.mxu1 %v3432_v18 }
  0xea   :  { %2676 = vmatprep.subr.mxu0 %v3204_v1  ;;  %2709 = vmatprep.subr.mxu1 %v3204_v1 }
  0xeb   :  { %2677 = vmatpush3.msra.mxu0 %v3450_v20  ;;  %2710 = vmatpush3.msra.mxu1 %v3441_v19 }
  0xec   :  { %2678 = vmatprep.subr.mxu0 %v3204_v1  ;;  %2711 = vmatprep.subr.mxu1 %v3204_v1 }
  0xed   :  { %2679 = vmatpush3.msra.mxu0 %v3459_v21  ;;  %2712 = vmatpush3.msra.mxu1 %v3450_v20 }
  0xee   :  { %2681 = vmatmul.mubr.f32.vlgmr.msra.gmra.mxu0 %v3478_v24  ;;  %2713 = vmatprep.subr.mxu1 %v3204_v1 }
  0xef   :  { %2718 = vmatprep.subr.bf16.mxu0 %v3204_v1  ;;  %2714 = vmatpush3.msra.mxu1 %v3459_v21 }
  0xf0   :  { %2715 = vmatprep.mubr.msk.f32.mxu1 %vm3205_vm1, %v3204_v1  ;;  %2719 = vmatpush3.bf16.msra.mxu0 %v453_v33  ;;  %v837_v33 = vpop.permute.xlu0 %836 }
  0xf1   :  { %2716 = vmatmul.mubr.f32.vlgmr.msra.gmra.mxu1 %v123_v32  ;;  %2720 = vmatprep.mubr.msk.bf16.mxu0 %vm3205_vm1, %v3204_v1 }
  0xf2   :  { %2724 = vmatprep.subr.mxu1 %v3204_v1  ;;  %2759 = vmatprep.subr.mxu0 %v3204_v1 }
  0xf3   :  { %2721 = vmatmul.mubr.msk.bf16.vlgmr.msra.gmra.mxu0 %vm75_vm2, %v3310_v4  ;;  %2725 = vmatpush3.msra.mxu1 %v3323_v6 }
  0xf4   :  { %2726 = vmatprep.subr.mxu1 %v3204_v1  ;;  %2760 = vmatpush3.msra.mxu0 %v3323_v6 }
  0xf5   :  { %2727 = vmatpush3.msra.mxu1 %v3333_v7  ;;  %2761 = vmatprep.subr.mxu0 %v3204_v1 }
  0xf6   :  { %2728 = vmatprep.subr.mxu1 %v3204_v1  ;;  %2762 = vmatpush3.msra.mxu0 %v3333_v7 }
  0xf7   :  { %2729 = vmatpush3.msra.mxu1 %v3342_v8  ;;  %2763 = vmatprep.subr.mxu0 %v3204_v1 }
  0xf8   :  { %2730 = vmatprep.subr.mxu1 %v3204_v1  ;;  %2764 = vmatpush3.msra.mxu0 %v3342_v8 }
  0xf9   :  { %2731 = vmatpush3.msra.mxu1 %v3351_v9  ;;  %2765 = vmatprep.subr.mxu0 %v3204_v1 }
  0xfa   :  { %2732 = vmatprep.subr.mxu1 %v3204_v1  ;;  %2766 = vmatpush3.msra.mxu0 %v3351_v9 }
  0xfb   :  { %2733 = vmatpush3.msra.mxu1 %v3360_v10  ;;  %2767 = vmatprep.subr.mxu0 %v3204_v1 }
  0xfc   :  { %2734 = vmatprep.subr.mxu1 %v3204_v1  ;;  %2768 = vmatpush3.msra.mxu0 %v3360_v10 }
  0xfd   :  { %2735 = vmatpush3.msra.mxu1 %v3369_v11  ;;  %2769 = vmatprep.subr.mxu0 %v3204_v1 }
  0xfe   :  { %2736 = vmatprep.subr.mxu1 %v3204_v1  ;;  %2770 = vmatpush3.msra.mxu0 %v3369_v11 }
  0xff   :  { %2737 = vmatpush3.msra.mxu1 %v3378_v12  ;;  %2771 = vmatprep.subr.mxu0 %v3204_v1 }
 0x100   :  { %2738 = vmatprep.subr.mxu1 %v3204_v1  ;;  %2772 = vmatpush3.msra.mxu0 %v3378_v12 }
 0x101   :  { %2739 = vmatpush3.msra.mxu1 %v3387_v13  ;;  %2773 = vmatprep.subr.mxu0 %v3204_v1 }
 0x102   :  { %2740 = vmatprep.subr.mxu1 %v3204_v1  ;;  %2774 = vmatpush3.msra.mxu0 %v3387_v13 }
 0x103   :  { %2741 = vmatpush3.msra.mxu1 %v3396_v14  ;;  %2775 = vmatprep.subr.mxu0 %v3204_v1 }
 0x104   :  { %2742 = vmatprep.subr.mxu1 %v3204_v1  ;;  %2776 = vmatpush3.msra.mxu0 %v3396_v14 }
 0x105   :  { %2743 = vmatpush3.msra.mxu1 %v3405_v15  ;;  %2777 = vmatprep.subr.mxu0 %v3204_v1 }
 0x106   :  { %2744 = vmatprep.subr.mxu1 %v3204_v1  ;;  %2778 = vmatpush3.msra.mxu0 %v3405_v15 }
 0x107   :  { %2745 = vmatpush3.msra.mxu1 %v3414_v16  ;;  %2779 = vmatprep.subr.mxu0 %v3204_v1 }
 0x108   :  { %2746 = vmatprep.subr.mxu1 %v3204_v1  ;;  %2780 = vmatpush3.msra.mxu0 %v3414_v16 }
 0x109   :  { %2747 = vmatpush3.msra.mxu1 %v3423_v17  ;;  %2781 = vmatprep.subr.mxu0 %v3204_v1 }
 0x10a   :  { %2748 = vmatprep.subr.mxu1 %v3204_v1  ;;  %2782 = vmatpush3.msra.mxu0 %v3423_v17 }
 0x10b   :  { %2749 = vmatpush3.msra.mxu1 %v3432_v18  ;;  %2783 = vmatprep.subr.mxu0 %v3204_v1 }
 0x10c   :  { %2750 = vmatprep.subr.mxu1 %v3204_v1  ;;  %2784 = vmatpush3.msra.mxu0 %v3432_v18 }
 0x10d   :  { %2751 = vmatpush3.msra.mxu1 %v3441_v19  ;;  %2785 = vmatprep.subr.mxu0 %v3204_v1 }
 0x10e   :  { %2752 = vmatprep.subr.mxu1 %v3204_v1  ;;  %2786 = vmatpush3.msra.mxu0 %v3441_v19 }
 0x10f   :  { %2753 = vmatpush3.msra.mxu1 %v3450_v20  ;;  %2787 = vmatprep.subr.mxu0 %v3204_v1 }
 0x110   :  { %2754 = vmatprep.subr.mxu1 %v3204_v1  ;;  %2756 = vmatprep.mubr.msk.f32.mxu1 %vm3205_vm1, %v3204_v1 }
 0x111   :  { %2755 = vmatpush3.msra.mxu1 %v3459_v21  ;;  %2788 = vmatpush3.msra.mxu0 %v3450_v20 }
 0x112   :  { %2789 = vmatprep.subr.mxu0 %v3204_v1  ;;  %2794 = vmatprep.subr.bf16.mxu1 %v3204_v1 }
 0x113   :  { %2790 = vmatpush3.msra.mxu0 %v3459_v21  ;;  %2791 = vmatprep.mubr.msk.f32.mxu0 %vm3205_vm1, %v3204_v1 }
 0x114   :  { %2800 = vmatprep.subr.mxu0 %v3204_v1 }
 0x18e   :  { %v235_v34 = vpop.f32.mrf.mxu0 }
 0x190   :  { %v2612_v35 = vpop.f32.mrf.mxu0  ;;  %v306_v36 = vpop.f32.mrf.mxu1 }
 0x192   :  { %v2647_v37 = vpop.f32.mrf.mxu1 }
 0x193   :  { %v844_v37 = vpop.permute.xlu0 %843 }
 0x1ae   :  { %v376_v38 = vpop.f32.mrf.mxu0 }
 0x1af   :  { %v3628_v39 = vadd.f32 %v376_v38, %v235_v34 }
 0x1b0   :  { %v2682_v41 = vpop.f32.mrf.mxu0 }
 0x1b1   :  { %v446_v42 = vpop.f32.mrf.mxu1 }
 0x1b2   :  { %v3633_v43 = vadd.f32 %v446_v42, %v306_v36 }
 0x1b3   :  { %v2717_v45 = vpop.f32.mrf.mxu1  ;;  %v3636_v46 = vpop.f32.mrf.mxu0 }
 0x1b4   :  { %v565_v47 = vmul.f32 %v3636_v46, %v3636_v46  ;;  %2757 = vmatmul.mubr.f32.vlgmr.msra.gmra.mxu1 %v3636_v46 }
 0x1b5   :  { %v2722_v48 = vpop.f32.mrf.mxu0  ;;  %2795 = vmatpush3.bf16.msra.mxu1 %v641_v44  ;;  %2796 = vmatprep.mubr.msk.bf16.mxu1 %vm3205_vm1, %v3204_v1 }
 0x1b6   :  { %2792 = vmatmul.mubr.f32.vlgmr.msra.gmra.mxu0 %v565_v47  ;;  %2835 = vmatprep.subr.mxu1 %v3204_v1 }
 0x1b7   :  { %v492_v49 = vpop.f32.mrf.mxu0  ;;  %2801 = vmatpush3.msra.mxu0 %v3323_v6  ;;  %2832 = vmatprep.mubr.msk.f32.mxu0 %vm3205_vm1, %v3204_v1 }
 0x1b8   :  { %2797 = vmatmul.mubr.msk.bf16.vlgmr.msra.gmra.mxu1 %vm75_vm2, %v3310_v4  ;;  %2802 = vmatprep.subr.mxu0 %v3204_v1 }
 0x1b9   :  { %v2723_v50 = vpop.f32.mrf.mxu0  ;;  %2803 = vmatpush3.msra.mxu0 %v3333_v7  ;;  %2836 = vmatpush3.msra.mxu1 %v3323_v6 }
 0x1ba   :  { %2804 = vmatprep.subr.mxu0 %v3204_v1  ;;  %2837 = vmatprep.subr.mxu1 %v3204_v1 }
 0x1bb   :  { %2805 = vmatpush3.msra.mxu0 %v3342_v8  ;;  %2838 = vmatpush3.msra.mxu1 %v3333_v7 }
 0x1bc   :  { %2806 = vmatprep.subr.mxu0 %v3204_v1  ;;  %2839 = vmatprep.subr.mxu1 %v3204_v1 }
 0x1bd   :  { %2807 = vmatpush3.msra.mxu0 %v3351_v9  ;;  %2840 = vmatpush3.msra.mxu1 %v3342_v8 }
 0x1be   :  { %2808 = vmatprep.subr.mxu0 %v3204_v1  ;;  %2841 = vmatprep.subr.mxu1 %v3204_v1 }
 0x1bf   :  { %2809 = vmatpush3.msra.mxu0 %v3360_v10  ;;  %2842 = vmatpush3.msra.mxu1 %v3351_v9 }
 0x1c0   :  { %2810 = vmatprep.subr.mxu0 %v3204_v1  ;;  %2843 = vmatprep.subr.mxu1 %v3204_v1 }
 0x1c1   :  { %2811 = vmatpush3.msra.mxu0 %v3369_v11  ;;  %2844 = vmatpush3.msra.mxu1 %v3360_v10 }
 0x1c2   :  { %2812 = vmatprep.subr.mxu0 %v3204_v1  ;;  %2845 = vmatprep.subr.mxu1 %v3204_v1 }
 0x1c3   :  { %2813 = vmatpush3.msra.mxu0 %v3378_v12  ;;  %2846 = vmatpush3.msra.mxu1 %v3369_v11 }
 0x1c4   :  { %2814 = vmatprep.subr.mxu0 %v3204_v1  ;;  %2847 = vmatprep.subr.mxu1 %v3204_v1 }
 0x1c5   :  { %2815 = vmatpush3.msra.mxu0 %v3387_v13  ;;  %2848 = vmatpush3.msra.mxu1 %v3378_v12 }
 0x1c6   :  { %2816 = vmatprep.subr.mxu0 %v3204_v1  ;;  %2849 = vmatprep.subr.mxu1 %v3204_v1 }
 0x1c7   :  { %2817 = vmatpush3.msra.mxu0 %v3396_v14  ;;  %2850 = vmatpush3.msra.mxu1 %v3387_v13 }
 0x1c8   :  { %2818 = vmatprep.subr.mxu0 %v3204_v1  ;;  %2851 = vmatprep.subr.mxu1 %v3204_v1 }
 0x1c9   :  { %2819 = vmatpush3.msra.mxu0 %v3405_v15  ;;  %2852 = vmatpush3.msra.mxu1 %v3396_v14 }
 0x1ca   :  { %2820 = vmatprep.subr.mxu0 %v3204_v1  ;;  %2853 = vmatprep.subr.mxu1 %v3204_v1 }
 0x1cb   :  { %2821 = vmatpush3.msra.mxu0 %v3414_v16  ;;  %2854 = vmatpush3.msra.mxu1 %v3405_v15 }
 0x1cc   :  { %2822 = vmatprep.subr.mxu0 %v3204_v1  ;;  %2855 = vmatprep.subr.mxu1 %v3204_v1 }
 0x1cd   :  { %2823 = vmatpush3.msra.mxu0 %v3423_v17  ;;  %2856 = vmatpush3.msra.mxu1 %v3414_v16 }
 0x1ce   :  { %2824 = vmatprep.subr.mxu0 %v3204_v1  ;;  %2857 = vmatprep.subr.mxu1 %v3204_v1 }
 0x1cf   :  { %2825 = vmatpush3.msra.mxu0 %v3432_v18  ;;  %2858 = vmatpush3.msra.mxu1 %v3423_v17 }
 0x1d0   :  { %2826 = vmatprep.subr.mxu0 %v3204_v1  ;;  %2859 = vmatprep.subr.mxu1 %v3204_v1 }
 0x1d1   :  { %2827 = vmatpush3.msra.mxu0 %v3441_v19  ;;  %2860 = vmatpush3.msra.mxu1 %v3432_v18 }
 0x1d2   :  { %2828 = vmatprep.subr.mxu0 %v3204_v1  ;;  %2861 = vmatprep.subr.mxu1 %v3204_v1 }
 0x1d3   :  { %2829 = vmatpush3.msra.mxu0 %v3450_v20  ;;  %2862 = vmatpush3.msra.mxu1 %v3441_v19 }
 0x1d4   :  { %2830 = vmatprep.subr.mxu0 %v3204_v1  ;;  %2863 = vmatprep.subr.mxu1 %v3204_v1 }
 0x1d5   :  { %2831 = vmatpush3.msra.mxu0 %v3459_v21  ;;  %2864 = vmatpush3.msra.mxu1 %v3450_v20 }
 0x1d6   :  { %2865 = vmatprep.subr.mxu1 %v3204_v1  ;;  %2867 = vmatprep.mubr.msk.f32.mxu1 %vm3205_vm1, %v3204_v1 }
 0x1d7   :  { %2866 = vmatpush3.msra.mxu1 %v3459_v21  ;;  %2870 = vmatprep.subr.mxu0 %v3204_v1 }
 0x1d8   :  { %2875 = vmatprep.subr.mxu1 %v3204_v1 }
 0x274   :  { %v561_v54 = vpop.f32.mrf.mxu1 }
 0x275   :  { %v636_v55 = vadd.f32 %v561_v54, %v3628_v39 }
 0x276   :  { %v2758_v56 = vpop.f32.mrf.mxu1  ;;  %v632_v57 = vpop.f32.mrf.mxu0 }
 0x277   :  { %v637_v58 = vadd.f32 %v632_v57, %v3633_v43 }
 0x278   :  { %v2793_v59 = vpop.f32.mrf.mxu0  ;;  %v3722_v60 = vpop.f32.mrf.mxu1 }
 0x279   :  { %v753_v61 = vmul.f32 %v3722_v60, %v3722_v60  ;;  %2833 = vmatmul.mubr.f32.vlgmr.msra.gmra.mxu0 %v3722_v60  ;;  %v1628_v59 = vld [vmem:[%s4144_s13 + $0x8] sm:$0xff] }
 0x27a   :  { %v2798_v62 = vpop.f32.mrf.mxu1  ;;  %2872 = vmatprep.mubr.msk.f32.mxu0 %vm3205_vm1, %v3204_v1  ;;  %2871 = vmatpush3.msra.mxu0 %v3734_v2 }
 0x27b   :  { %2868 = vmatmul.mubr.f32.vlgmr.msra.gmra.mxu1 %v753_v61  ;;  %2880 = vmatprep.subr.bf16.mxu0 %v3204_v1  ;;  %v2039_v61 = vld [vmem:[%s4146_s15 + $0x8] sm:$0xff]  ;;  %v1009_v62 = vlaneseq }
 0x27c   :  { %v680_v63 = vpop.f32.mrf.mxu1  ;;  %2877 = vmatprep.mubr.msk.f32.mxu1 %vm3205_vm1, %v3204_v1  ;;  %2876 = vmatpush3.msra.mxu1 %v3734_v2 }
 0x27d   :  { %2890 = vmatprep.subr.mxu1 %v3204_v1  ;;  %v1010_v63 = vshrl.u32 %v1009_v62, 7 }
 0x27e   :  { %v2799_v0 = vpop.f32.mrf.mxu1 }
 0x27f   :  { %v1033_v0 = vsub.s32 1, %v1010_v63 }
 0x339   :  { %v749_v3 = vpop.f32.mrf.mxu0 }
 0x33a   :  { %v824_v4 = vadd.f32 %v749_v3, %v636_v55  ;;  %v72_v3 = vld [vmem:[%s4136_s5] sm:$0xf] }
 0x33b   :  { %v2834_v23 = vpop.f32.mrf.mxu0  ;;  %v820_v25 = vpop.f32.mrf.mxu1 }
 0x33c   :  { %v828_v26 = vmul.f32 0.00390625, %v824_v4  ;;  %v825_v27 = vadd.f32 %v820_v25, %v637_v58  ;;  %v1626_v58 = vld [vmem:[%s4143_s12 + $0x8] sm:$0xff]  ;;  %v1034_v4 = vrot.slane %v72_v3, %v1033_v0  ;;  %v1020_v23 = vsub.s32 2, %v1010_v63 }
 0x33d   :  { %v2869_v28 = vpop.f32.mrf.mxu1 }
 0x33e   :  { %v830_v29 = vmul.f32 %v828_v26, %v828_v26  ;;  %v829_v30 = vmul.f32 0.00390625, %v825_v27 }
 0x340   :  { %v831_v31 = vsub.f32 %v829_v30, %v830_v29  ;;  %v1021_v29 = vrot.slane %v72_v3, %v1020_v23  ;;  %v1011_v30 = vsub.s32 3, %v1010_v63 }
 0x342   :  { %v832_v32 = vadd.f32 1e-05, %v831_v31 }
 0x344   :  { %3154 = vrsqrt.f32 %v832_v32 }
 0x351   :  { %v3155_v34 = vpop.eup %3154 }
 0x352   :  { %v839_v35 = vmul.f32 %v3155_v34, %v837_v33 }
 0x354   :  { %v840_v36 = vmul.f32 %v839_v35, %v828_v26  ;;  %2873 = vmatmul.mubr.msk.f32.vlgmr.msra.gmra.mxu0 %vm75_vm2, %v839_v35 }
 0x355   :  { %2886 = vmatprep.mubr.msk.bf16.mxu0 %vm3205_vm1, %v3204_v1 }
 0x356   :  { %v846_v38 = vsub.f32 %v844_v37, %v840_v36  ;;  %v1012_v37 = vrot.slane %v72_v3, %v1011_v30  ;;  %v3982_v30 = vld [vmem:[%s4137_s6 + $0x30] sm:$0xff] }
 0x358   :  { %2878 = vmatmul.mubr.msk.f32.vlgmr.msra.gmra.mxu1 %vm75_vm2, %v846_v38 }
 0x359   :  { %2891 = vmatpush3.msra.mxu1 %v3323_v6  ;;  %2922 = vmatprep.mubr.msk.f32.mxu1 %vm3205_vm1, %v3204_v1 }
 0x35a   :  { %2892 = vmatprep.subr.mxu1 %v3204_v1 }
 0x35b   :  { %2893 = vmatpush3.msra.mxu1 %v3333_v7 }
 0x35c   :  { %2894 = vmatprep.subr.mxu1 %v3204_v1 }
 0x35d   :  { %2895 = vmatpush3.msra.mxu1 %v3342_v8 }
 0x35e   :  { %2896 = vmatprep.subr.mxu1 %v3204_v1 }
 0x35f   :  { %2897 = vmatpush3.msra.mxu1 %v3351_v9 }
 0x360   :  { %2898 = vmatprep.subr.mxu1 %v3204_v1 }
 0x361   :  { %2899 = vmatpush3.msra.mxu1 %v3360_v10 }
 0x362   :  { %2900 = vmatprep.subr.mxu1 %v3204_v1 }
 0x363   :  { %2901 = vmatpush3.msra.mxu1 %v3369_v11 }
 0x364   :  { %2902 = vmatprep.subr.mxu1 %v3204_v1 }
 0x365   :  { %2903 = vmatpush3.msra.mxu1 %v3378_v12 }
 0x366   :  { %2904 = vmatprep.subr.mxu1 %v3204_v1 }
 0x367   :  { %2905 = vmatpush3.msra.mxu1 %v3387_v13 }
 0x368   :  { %2906 = vmatprep.subr.mxu1 %v3204_v1 }
 0x369   :  { %2907 = vmatpush3.msra.mxu1 %v3396_v14 }
 0x36a   :  { %2908 = vmatprep.subr.mxu1 %v3204_v1 }
 0x36b   :  { %2909 = vmatpush3.msra.mxu1 %v3405_v15 }
 0x36c   :  { %2910 = vmatprep.subr.mxu1 %v3204_v1 }
 0x36d   :  { %2911 = vmatpush3.msra.mxu1 %v3414_v16 }
 0x36e   :  { %2912 = vmatprep.subr.mxu1 %v3204_v1 }
 0x36f   :  { %2913 = vmatpush3.msra.mxu1 %v3423_v17 }
 0x370   :  { %2914 = vmatprep.subr.mxu1 %v3204_v1 }
 0x371   :  { %2915 = vmatpush3.msra.mxu1 %v3432_v18 }
 0x372   :  { %2916 = vmatprep.subr.mxu1 %v3204_v1 }
 0x373   :  { %2917 = vmatpush3.msra.mxu1 %v3441_v19 }
 0x374   :  { %2918 = vmatprep.subr.mxu1 %v3204_v1 }
 0x375   :  { %2919 = vmatpush3.msra.mxu1 %v3450_v20 }
 0x376   :  { %2920 = vmatprep.subr.mxu1 %v3204_v1 }
 0x377   :  { %2921 = vmatpush3.msra.mxu1 %v3459_v21 }
 0x378   :  { %2960 = vmatprep.subr.mxu1 %v3204_v1 }
 0x414   :  { %v916_v39 = vpop.f32.mrf.mxu0 }
 0x415   :  { %v920_v41 = vmul.f32 %v916_v39, %v3478_v24  ;;  %v996_v42 = vmul.f32 %v916_v39, %v3473_v22  ;;  %v1002_v43 = vmul.f32 %v916_v39, %v3722_v60  ;;  %v999_v45 = vmul.f32 %v916_v39, %v3636_v46  ;;  %v1248_v46 = vld [vmem:[%s4142_s11] sm:$0xf]  ;;  %v2037_v60 = vld [vmem:[%s4145_s14 + $0x8] sm:$0xff] }
 0x416   :  { %v2874_v40 = vpop.f32.mrf.mxu0 }
 0x418   :  { %v990_v44 = vpop.f32.mrf.mxu1 }
 0x419   :  { %v994_v47 = vadd.f32 %v990_v44, %v920_v41  ;;  %v1003_v48 = vadd.f32 %v1002_v43, %v990_v44  ;;  %v997_v49 = vadd.f32 %v996_v42, %v990_v44  ;;  %v1000_v53 = vadd.f32 %v999_v45, %v990_v44 }
 0x41a   :  { %v2879_v50 = vpop.f32.mrf.mxu1 }
 0x41b   :  { %v1004_v51 = vmax.f32 %v1003_v48, 0.0  ;;  %v998_v52 = vmax.f32 %v997_v49, 0.0  ;;  %v995_v54 = vmax.f32 %v994_v47, 0.0  ;;  %v1001_v56 = vmax.f32 %v1000_v53, 0.0  ;;  %v1057_v47 = vld [vmem:[%s4133_s2] sm:$0x3] }
 0x41c   :  { %v3880_v50 = vld [vmem:[%s4137_s6 + $0x70] sm:$0xff]  ;;  %v3894_v53 = vld [vmem:[%s4137_s6 + $0x60] sm:$0xff] }
 0x41d   :  { %1036 = vrot.lane.b32.xlu1 %v1004_v51, %s3207_s7  ;;  %1028 = vrot.lane.b32.xlu0 %v998_v52, %s3207_s7  ;;  %v1046_v24 = vrot.slane %v998_v52, 4  ;;  %v1056_v55 = vpack.c.bf16 %v1004_v51, %v1004_v51  ;;  %v1048_v27 = vrot.slane %v1001_v56, 4  ;;  %v3887_v52 = vld [vmem:[%s4137_s6 + $0x68] sm:$0xff] }
 0x41f   :  { %v1064_v22 = vsel %vm1062_vm3, %v1056_v55, 0  ;;  %v1052_v57 = vsel %vm79_vm0, %v995_v54, %v1046_v24  ;;  %v3901_v54 = vld [vmem:[%s4137_s6 + $0x58] sm:$0xff]  ;;  %v3908_v24 = vld [vmem:[%s4137_s6 + $0x50] sm:$0xff]  ;;  %v3915_v55 = vld [vmem:[%s4137_s6 + $0x48] sm:$0xff] }
 0x420   :  { %2881 = vmatpush3.bf16.msra.mxu0 %v1064_v22  ;;  %v3922_v22 = vld [vmem:[%s4137_s6 + $0x40] sm:$0xff] }
 0x421   :  { %1015 = vrot.lane.b32.xlu1 %v1001_v56, %s3208_s21  ;;  %1023 = vrot.lane.b32.xlu0 %v1004_v51, %s3208_s21  ;;  %v3930_v56 = vld [vmem:[%s4137_s6 + $0x38] sm:$0xff] }
 0x422   :  { %2882 = vmatprep.subr.bf16.mxu0 %v3204_v1 }
 0x425   :  { %1006 = vrot.lane.b32.xlu1 %v1004_v51, %s3209_s25  ;;  %1264 = vperm.xlu0 %3150, %v1248_v46  }
 0x429   :  { %1648 = vperm.xlu0 %3150, %v1626_v58  }
 0x42d   :  { %1662 = vperm.xlu0 %3150, %v1628_v59  }
 0x431   :  { %2059 = vperm.xlu0 %3150, %v2037_v60  }
 0x435   :  { %2073 = vperm.xlu0 %3150, %v2039_v61  }
 0x48f   :  { %v1037_v25 = vpop.permute.xlu1 %1036  ;;  %v1029_v26 = vpop.permute.xlu0 %1028 }
 0x490   :  { %v1039_v28 = vmul.f32 %v1037_v25, %v1034_v4  ;;  %v1035_v35 = vmul.f32 %v1034_v4, %v1029_v26 }
 0x492   :  { %v1053_v31 = vsel %vm79_vm0, %v1039_v28, %v1048_v27  ;;  %v1044_v40 = vrot.slane %v1035_v35, 4  ;;  %v4017_v35 = vld [vmem:[%s4137_s6 + $0x8] sm:$0xff] }
 0x493   :  { %v1055_v32 = vpack.c.bf16 %v1053_v31, %v1052_v57  ;;  %v1016_v33 = vpop.permute.xlu1 %1015  ;;  %v1024_v34 = vpop.permute.xlu0 %1023  ;;  %v3989_v31 = vld [vmem:[%s4137_s6 + $0x28] sm:$0xff] }
 0x494   :  { %v1022_v36 = vmul.f32 %v1021_v29, %v1016_v33  ;;  %v1026_v38 = vmul.f32 %v1024_v34, %v1021_v29  ;;  %v3152_v29 = vld [vmem:[%s4134_s3] sm:$0xff]   ;;  %v4003_v33 = vld [vmem:[%s4137_s6 + $0x18] sm:$0xff]  ;;  %v4010_v34 = vld [vmem:[%s4137_s6 + $0x10] sm:$0xff] }
 0x495   :  { %2883 = vmatpush3.bf16.msra.mxu0 %v1055_v32  ;;  %v3996_v32 = vld [vmem:[%s4137_s6 + $0x20] sm:$0xff] }
 0x496   :  { %2884 = vmatprep.subr.bf16.mxu0 %v3204_v1  ;;  %v1041_v41 = vrot.slane %v1022_v36, 4  ;;  %v1051_v43 = vsel %vm79_vm0, %v1026_v38, %v1044_v40  ;;  %v4024_v36 = vld [vmem:[%s4137_s6] sm:$0xff] }
 0x497   :  { %v1007_v39 = vpop.permute.xlu1 %1006 }
 0x498   :  { %v1013_v42 = vmul.f32 %v1012_v37, %v1007_v39 }
 0x49a   :  { %v1050_v44 = vsel %vm79_vm0, %v1013_v42, %v1041_v41 }
 0x49b   :  { %v1054_v45 = vpack.c.bf16 %v1051_v43, %v1050_v44 }
 0x49d   :  { %2885 = vmatpush3.bf16.msra.mxu0 %v1054_v45 }
 0x49e   :  { %2925 = vmatprep.subr.mxu0 %v3204_v1 }
 0x4a0   :  { %2887 = vmatmul.mubr.msk.bf16.vlgmr.msra.gmra.mxu0 %vm1058_vm4, %v1057_v47  ;;  %v1265_v62 = vpop.permute.xlu0 %1264 }
 0x4a1   :  { %2926 = vmatpush3.msra.mxu0 %v3323_v6  ;;  %2957 = vmatprep.mubr.msk.f32.mxu0 %vm3205_vm1, %v3204_v1  ;;  %v3849_v6 = vld [vmem:[%s4137_s6 + $0x78] sm:$0xff] }
 0x4a2   :  { %2927 = vmatprep.subr.mxu0 %v3204_v1 }
 0x4a3   :  { %2928 = vmatpush3.msra.mxu0 %v3333_v7  ;;  %v1247_v7 = vld [vmem:[%s4141_s10] sm:$0xf] }
 0x4a4   :  { %2929 = vmatprep.subr.mxu0 %v3204_v1  ;;  %1257 = vperm.xlu1 %3151, %v1247_v7  }
 0x4a5   :  { %2930 = vmatpush3.msra.mxu0 %v3342_v8  ;;  %v1625_v8 = vld [vmem:[%s4143_s12] sm:$0xff] }
 0x4a6   :  { %2931 = vmatprep.subr.mxu0 %v3204_v1 }
 0x4a7   :  { %2932 = vmatpush3.msra.mxu0 %v3351_v9  ;;  %v1627_v9 = vld [vmem:[%s4144_s13] sm:$0xff] }
 0x4a8   :  { %2933 = vmatprep.subr.mxu0 %v3204_v1  ;;  %1643 = vperm.xlu1 %3151, %v1625_v8  }
 0x4a9   :  { %2934 = vmatpush3.msra.mxu0 %v3360_v10  ;;  %v2036_v10 = vld [vmem:[%s4145_s14] sm:$0xff] }
 0x4aa   :  { %2935 = vmatprep.subr.mxu0 %v3204_v1 }
 0x4ab   :  { %2936 = vmatpush3.msra.mxu0 %v3369_v11  ;;  %v2038_v11 = vld [vmem:[%s4146_s15] sm:$0xff] }
 0x4ac   :  { %2937 = vmatprep.subr.mxu0 %v3204_v1  ;;  %1657 = vperm.xlu1 %3151, %v1627_v9  }
 0x4ad   :  { %2938 = vmatpush3.msra.mxu0 %v3378_v12 }
 0x4ae   :  { %2939 = vmatprep.subr.mxu0 %v3204_v1 }
 0x4af   :  { %2940 = vmatpush3.msra.mxu0 %v3387_v13 }
 0x4b0   :  { %2941 = vmatprep.subr.mxu0 %v3204_v1  ;;  %2054 = vperm.xlu1 %3151, %v2036_v10  }
 0x4b1   :  { %2942 = vmatpush3.msra.mxu0 %v3396_v14 }
 0x4b2   :  { %2943 = vmatprep.subr.mxu0 %v3204_v1 }
 0x4b3   :  { %2944 = vmatpush3.msra.mxu0 %v3405_v15 }
 0x4b4   :  { %2945 = vmatprep.subr.mxu0 %v3204_v1  ;;  %2068 = vperm.xlu1 %3151, %v2038_v11  }
 0x4b5   :  { %2946 = vmatpush3.msra.mxu0 %v3414_v16 }
 0x4b6   :  { %2947 = vmatprep.subr.mxu0 %v3204_v1 }
 0x4b7   :  { %2948 = vmatpush3.msra.mxu0 %v3423_v17 }
 0x4b8   :  { %2949 = vmatprep.subr.mxu0 %v3204_v1 }
 0x4b9   :  { %2950 = vmatpush3.msra.mxu0 %v3432_v18 }
 0x4ba   :  { %2951 = vmatprep.subr.mxu0 %v3204_v1 }
 0x4bb   :  { %2952 = vmatpush3.msra.mxu0 %v3441_v19 }
 0x4bc   :  { %2953 = vmatprep.subr.mxu0 %v3204_v1 }
 0x4bd   :  { %2954 = vmatpush3.msra.mxu0 %v3450_v20 }
 0x4be   :  { %2955 = vmatprep.subr.mxu0 %v3204_v1 }
 0x4bf   :  { %2956 = vmatpush3.msra.mxu0 %v3459_v21 }
 0x4c0   :  { %2976 = vmatprep.subr.mxu0 %v3849_v6 }
 0x51f   :  { %v1258_v60 = vpop.permute.xlu1 %1257 }
 0x560   :  { %v3867_v12 = vpop.f32.mrf.mxu0 }
 0x561   :  { %v1176_v13 = vmul.f32 %v3867_v12, %v3867_v12  ;;  %2923 = vmatmul.mubr.f32.vlgmr.msra.gmra.mxu1 %v3867_v12 }
 0x562   :  { %v2888_v48 = vpop.f32.mrf.mxu0  ;;  %2961 = vmatpush3.msra.mxu1 %v3734_v2  ;;  %2962 = vmatprep.mubr.msk.f32.mxu1 %vm3205_vm1, %v3204_v1 }
 0x563   :  { %2958 = vmatmul.mubr.f32.vlgmr.msra.gmra.mxu0 %v1176_v13  ;;  %2965 = vmatprep.subr.mxu1 %v3204_v1 }
 0x564   :  { %v1103_v49 = vpop.f32.mrf.mxu0  ;;  %2977 = vmatpush3.msra.mxu0 %v3849_v6 }
 0x565   :  { %2978 = vmatprep.subr.mxu0 %v3880_v50 }
 0x566   :  { %v2889_v51 = vpop.f32.mrf.mxu0  ;;  %2979 = vmatpush3.msra.mxu0 %v3880_v50 }
 0x567   :  { %2980 = vmatprep.subr.mxu0 %v3887_v52 }
 0x568   :  { %2981 = vmatpush3.msra.mxu0 %v3887_v52 }
 0x569   :  { %2982 = vmatprep.subr.mxu0 %v3894_v53 }
 0x56a   :  { %2983 = vmatpush3.msra.mxu0 %v3894_v53 }
 0x56b   :  { %2984 = vmatprep.subr.mxu0 %v3901_v54 }
 0x56c   :  { %2985 = vmatpush3.msra.mxu0 %v3901_v54 }
 0x56d   :  { %2986 = vmatprep.subr.mxu0 %v3908_v24 }
 0x56e   :  { %2987 = vmatpush3.msra.mxu0 %v3908_v24 }
 0x56f   :  { %2988 = vmatprep.subr.mxu0 %v3915_v55 }
 0x570   :  { %2989 = vmatpush3.msra.mxu0 %v3915_v55 }
 0x571   :  { %2990 = vmatprep.subr.mxu0 %v3922_v22 }
 0x572   :  { %2991 = vmatpush3.msra.mxu0 %v3922_v22 }
 0x573   :  { %2992 = vmatprep.subr.mxu0 %v3396_v14 }
 0x574   :  { %2993 = vmatpush3.msra.mxu0 %v3930_v56 }
 0x575   :  { %2994 = vmatprep.subr.mxu0 %v3405_v15 }
 0x576   :  { %2995 = vmatpush3.msra.mxu0 %v3405_v15 }
 0x577   :  { %2996 = vmatprep.subr.mxu0 %v3414_v16 }
 0x578   :  { %2997 = vmatpush3.msra.mxu0 %v3414_v16 }
 0x579   :  { %2998 = vmatprep.subr.mxu0 %v3423_v17 }
 0x57a   :  { %2999 = vmatpush3.msra.mxu0 %v3423_v17 }
 0x57b   :  { %3000 = vmatprep.subr.mxu0 %v3432_v18 }
 0x57c   :  { %3001 = vmatpush3.msra.mxu0 %v3432_v18 }
 0x57d   :  { %3002 = vmatprep.subr.mxu0 %v3441_v19 }
 0x57e   :  { %3003 = vmatpush3.msra.mxu0 %v3441_v19 }
 0x57f   :  { %3004 = vmatprep.subr.mxu0 %v3450_v20 }
 0x580   :  { %3005 = vmatpush3.msra.mxu0 %v3450_v20 }
 0x581   :  { %3006 = vmatprep.subr.mxu0 %v3459_v21 }
 0x582   :  { %3007 = vmatpush3.msra.mxu0 %v3459_v21 }
 0x583   :  { %3046 = vmatprep.subr.mxu0 %v3734_v2 }
 0x621   :  { %v1172_v14 = vpop.f32.mrf.mxu1 }
 0x622   :  { %v1249_v15 = vmul.f32 0.015625, %v1172_v14 }
 0x623   :  { %v2924_v16 = vpop.f32.mrf.mxu1  ;;  %v1243_v17 = vpop.f32.mrf.mxu0 }
 0x624   :  { %v1251_v57 = vmul.f32 %v1249_v15, %v1249_v15  ;;  %v1250_v18 = vmul.f32 0.015625, %v1243_v17  ;;  %v1644_v16 = vpop.permute.xlu1 %1643 }
 0x625   :  { %v2959_v46 = vpop.f32.mrf.mxu0 }
 0x626   :  { %v1252_v58 = vsub.f32 %v1250_v18, %v1251_v57 }
 0x628   :  { %v1253_v59 = vadd.f32 1e-05, %v1252_v58 }
 0x62a   :  { %3156 = vrsqrt.f32 %v1253_v59  ;;  %v1658_v59 = vpop.permute.xlu1 %1657 }
 0x637   :  { %v3157_v19 = vpop.eup %3156 }
 0x638   :  { %v1260_v61 = vmul.f32 %v3157_v19, %v1258_v60  ;;  %v3153_v19 = vld [vmem:[%s4135_s4] sm:$0xff]   ;;  %s3210_s4 = smov [#allocation2]  }
 0x639   :  { %s2253_s1 = sshll.u32 %s3210_s4, 4  ;;  %s2254_s1 = int_to_ptr.vmem [resolvable:$true] %s2253_s1 }
 0x63a   :  { %v1261_v20 = vmul.f32 %v1260_v61, %v1249_v15  ;;  %2963 = vmatmul.mubr.msk.f32.vlgmr.msra.gmra.mxu1 %vm75_vm2, %v1260_v61  ;;  %v1649_v15 = vpop.permute.xlu0 %1648  ;;  %s3182_s30 = scalar_lea.vmem %s2254_s1, 256  ;;  %p3187_p1 = scmp.lt.s32.totalorder %s2254_s1, %s2254_s1 }
 0x63b   :  { %2966 = vmatpush3.msra.mxu1 %v3734_v2  ;;  %2967 = vmatprep.mubr.msk.f32.mxu1 %vm3205_vm1, %v3204_v1  ;;  %p3183_p0 = scmp.ne.s32.totalorder %s2254_s1, %s3182_s30  ;;  %p3188_p2 = scmp.lt.s32.totalorder %s3182_s30, %s3182_s30 }
 0x63c   :  { %v1267_v21 = vsub.f32 %v1265_v62, %v1261_v20  ;;  %2970 = vmatprep.subr.bf16.mxu1 %v3204_v1 }
 0x63d   :  { %p3189_p3 = por %p3188_p2, %p3187_p1 }
 0x63e   :  { %2968 = vmatmul.mubr.msk.f32.vlgmr.msra.gmra.mxu1 %vm75_vm2, %v1267_v21  ;;  %v1663_v60 = vpop.permute.xlu0 %1662 }
 0x63f   :  { %2972 = vmatprep.mubr.msk.bf16.mxu1 %vm3205_vm1, %v3204_v1  ;;  %p3190_p4 = pnand %p3189_p3, %p3183_p0 }
 0x6fa   :  { %v1337_v63 = vpop.f32.mrf.mxu1 }
 0x6fb   :  { %v1341_v3 = vmul.f32 %v1337_v63, %v3867_v12 }
 0x6fc   :  { %v2964_v0 = vpop.f32.mrf.mxu1 }
 0x6fe   :  { %v1411_v4 = vpop.f32.mrf.mxu1 }
 0x6ff   :  { %v1415_v23 = vadd.f32 %v1411_v4, %v1341_v3 }
 0x700   :  { %v2969_v25 = vpop.f32.mrf.mxu1 }
 0x701   :  { %v1416_v26 = vmax.f32 %v1415_v23, 0.0 }
 0x703   :  { %v1419_v27 = vpack.c.bf16 %v1416_v26, %v1416_v26 }
 0x705   :  { %v1430_v28 = vsel %vm1062_vm3, %v1419_v27, 0 }
 0x706   :  { %2971 = vmatpush3.bf16.msra.mxu1 %v1430_v28 }
 0x707   :  { %3011 = vmatprep.subr.mxu1 %v3849_v6 }
 0x709   :  { %2973 = vmatmul.mubr.msk.bf16.vlgmr.msra.gmra.mxu1 %vm1425_vm5, %v3152_v29 }
 0x70a   :  { %3012 = vmatpush3.msra.mxu1 %v3849_v6 }
 0x70b   :  { %3013 = vmatprep.subr.mxu1 %v3880_v50 }
 0x70c   :  { %3014 = vmatpush3.msra.mxu1 %v3880_v50 }
 0x70d   :  { %3015 = vmatprep.subr.mxu1 %v3887_v52 }
 0x70e   :  { %3016 = vmatpush3.msra.mxu1 %v3887_v52 }
 0x70f   :  { %3017 = vmatprep.subr.mxu1 %v3894_v53 }
 0x710   :  { %3018 = vmatpush3.msra.mxu1 %v3894_v53 }
 0x711   :  { %3019 = vmatprep.subr.mxu1 %v3901_v54 }
 0x712   :  { %3020 = vmatpush3.msra.mxu1 %v3901_v54 }
 0x713   :  { %3021 = vmatprep.subr.mxu1 %v3908_v24 }
 0x714   :  { %3022 = vmatpush3.msra.mxu1 %v3908_v24 }
 0x715   :  { %3023 = vmatprep.subr.mxu1 %v3915_v55 }
 0x716   :  { %3024 = vmatpush3.msra.mxu1 %v3915_v55 }
 0x717   :  { %3025 = vmatprep.subr.mxu1 %v3922_v22 }
 0x718   :  { %3026 = vmatpush3.msra.mxu1 %v3922_v22 }
 0x719   :  { %3027 = vmatprep.subr.mxu1 %v3930_v56 }
 0x71a   :  { %3028 = vmatpush3.msra.mxu1 %v3930_v56 }
 0x71b   :  { %3029 = vmatprep.subr.mxu1 %v3982_v30 }
 0x71c   :  { %3030 = vmatpush3.msra.mxu1 %v3982_v30 }
 0x71d   :  { %3031 = vmatprep.subr.mxu1 %v3989_v31 }
 0x71e   :  { %3032 = vmatpush3.msra.mxu1 %v3989_v31 }
 0x71f   :  { %3033 = vmatprep.subr.mxu1 %v3996_v32 }
 0x720   :  { %3034 = vmatpush3.msra.mxu1 %v3996_v32 }
 0x721   :  { %3035 = vmatprep.subr.mxu1 %v4003_v33 }
 0x722   :  { %3036 = vmatpush3.msra.mxu1 %v4003_v33 }
 0x723   :  { %3037 = vmatprep.subr.mxu1 %v4010_v34 }
 0x724   :  { %3038 = vmatpush3.msra.mxu1 %v4010_v34 }
 0x725   :  { %3039 = vmatprep.subr.mxu1 %v4017_v35 }
 0x726   :  { %3040 = vmatpush3.msra.mxu1 %v4017_v35 }
 0x727   :  { %3041 = vmatprep.subr.mxu1 %v4024_v36 }
 0x728   :  { %3042 = vmatpush3.msra.mxu1 %v4024_v36 }
 0x729   :  { %3051 = vmatprep.subr.mxu1 %v3734_v2 }
 0x7c9   :  { %v4029_v37 = vpop.f32.mrf.mxu1 }
 0x7ca   :  { %v1548_v38 = vmul.f32 %v4029_v37, %v4029_v37  ;;  %3008 = vmatprep.mubr.f32.mxu0 %v4029_v37 }
 0x7cb   :  { %v2974_v39 = vpop.f32.mrf.mxu1 }
 0x7cc   :  { %3043 = vmatprep.mubr.f32.mxu1 %v1548_v38 }
 0x7cd   :  { %v4034_v40 = vpop.f32.mrf.mxu1 }
 0x7ce   :  { %v1549_v41 = vmul.f32 %v4034_v40, %v4034_v40  ;;  %3009 = vmatmul.mubr.f32.vlgmr.msra.gmra.mxu0 %v4034_v40 }
 0x7cf   :  { %v2975_v42 = vpop.f32.mrf.mxu1  ;;  %3047 = vmatpush3.msra.mxu0 %v3734_v2 }
 0x7d0   :  { %3044 = vmatmul.mubr.f32.vlgmr.msra.gmra.mxu1 %v1549_v41  ;;  %3056 = vmatprep.subr.bf16.mxu0 %v3204_v1 }
 0x7d1   :  { %3052 = vmatpush3.msra.mxu1 %v3734_v2 }
 0x7d2   :  { %3062 = vmatprep.subr.mxu1 %v3849_v6 }
 0x88e   :  { %v3010_v43 = vpop.f32.mrf.mxu0 }
 0x88f   :  { %v1630_v44 = vmul.f32 0.015625, %v3010_v43 }
 0x890   :  { %v1539_v45 = vpop.f32.mrf.mxu0  ;;  %v3045_v47 = vpop.f32.mrf.mxu1 }
 0x891   :  { %v1634_v7 = vmul.f32 %v1630_v44, %v1630_v44  ;;  %v1629_v8 = vmul.f32 0.015625, %v1539_v45  ;;  %v1632_v9 = vmul.f32 0.015625, %v3045_v47 }
 0x892   :  { %v1616_v10 = vpop.f32.mrf.mxu1 }
 0x893   :  { %v1633_v11 = vmul.f32 %v1629_v8, %v1629_v8  ;;  %v1636_v12 = vsub.f32 %v1632_v9, %v1634_v7  ;;  %v1631_v13 = vmul.f32 0.015625, %v1616_v10 }
 0x895   :  { %v1638_v48 = vadd.f32 1e-05, %v1636_v12  ;;  %v1635_v49 = vsub.f32 %v1631_v13, %v1633_v11 }
 0x897   :  { %3158 = vrsqrt.f32 %v1638_v48  ;;  %v1637_v51 = vadd.f32 1e-05, %v1635_v49 }
 0x899   :  { %3160 = vrsqrt.f32 %v1637_v51 }
 0x8a4   :  { %v3159_v14 = vpop.eup %3158 }
 0x8a5   :  { %v1652_v17 = vmul.f32 %v3159_v14, %v1649_v15 }
 0x8a6   :  { %v3161_v57 = vpop.eup %3160 }
 0x8a7   :  { %v1651_v18 = vmul.f32 %v3161_v57, %v1644_v16  ;;  %v1654_v46 = vmul.f32 %v1652_v17, %v1630_v44 }
 0x8a9   :  { %3048 = vmatprep.mubr.msk.f32.mxu0 %vm75_vm2, %v1651_v18  ;;  %v1653_v58 = vmul.f32 %v1651_v18, %v1629_v8  ;;  %v1666_v20 = vsub.f32 %v1663_v60, %v1654_v46 }
 0x8aa   :  { %3049 = vmatmul.mubr.msk.f32.vlgmr.msra.gmra.mxu0 %vm75_vm2, %v1652_v17 }
 0x8ab   :  { %3057 = vmatpush3.bf16.msra.mxu0 %v3314_v5  ;;  %v1665_v61 = vsub.f32 %v1658_v59, %v1653_v58  ;;  %3058 = vmatprep.mubr.msk.bf16.mxu0 %vm3205_vm1, %v3204_v1 }
 0x8ac   :  { %3097 = vmatprep.subr.mxu0 %v3849_v6 }
 0x8ad   :  { %3053 = vmatprep.mubr.msk.f32.mxu1 %vm75_vm2, %v1665_v61 }
 0x8ae   :  { %3054 = vmatmul.mubr.msk.f32.vlgmr.msra.gmra.mxu1 %vm75_vm2, %v1666_v20  ;;  %3059 = vmatmul.mubr.msk.bf16.vlgmr.msra.gmra.mxu0 %vm75_vm2, %v3153_v19 }
 0x8af   :  { %3063 = vmatpush3.msra.mxu1 %v3849_v6  ;;  %3098 = vmatpush3.msra.mxu0 %v3849_v6 }
 0x8b0   :  { %3064 = vmatprep.subr.mxu1 %v3880_v50  ;;  %3099 = vmatprep.subr.mxu0 %v3880_v50 }
 0x8b1   :  { %3065 = vmatpush3.msra.mxu1 %v3880_v50  ;;  %3100 = vmatpush3.msra.mxu0 %v3880_v50 }
 0x8b2   :  { %3066 = vmatprep.subr.mxu1 %v3887_v52  ;;  %3101 = vmatprep.subr.mxu0 %v3887_v52 }
 0x8b3   :  { %3067 = vmatpush3.msra.mxu1 %v3887_v52  ;;  %3102 = vmatpush3.msra.mxu0 %v3887_v52 }
 0x8b4   :  { %3068 = vmatprep.subr.mxu1 %v3894_v53  ;;  %3103 = vmatprep.subr.mxu0 %v3894_v53 }
 0x8b5   :  { %3069 = vmatpush3.msra.mxu1 %v3894_v53  ;;  %3104 = vmatpush3.msra.mxu0 %v3894_v53 }
 0x8b6   :  { %3070 = vmatprep.subr.mxu1 %v3901_v54  ;;  %3105 = vmatprep.subr.mxu0 %v3901_v54 }
 0x8b7   :  { %3071 = vmatpush3.msra.mxu1 %v3901_v54  ;;  %3106 = vmatpush3.msra.mxu0 %v3901_v54 }
 0x8b8   :  { %3072 = vmatprep.subr.mxu1 %v3908_v24  ;;  %3107 = vmatprep.subr.mxu0 %v3908_v24 }
 0x8b9   :  { %3073 = vmatpush3.msra.mxu1 %v3908_v24  ;;  %3108 = vmatpush3.msra.mxu0 %v3908_v24 }
 0x8ba   :  { %3074 = vmatprep.subr.mxu1 %v3915_v55  ;;  %3109 = vmatprep.subr.mxu0 %v3915_v55 }
 0x8bb   :  { %3075 = vmatpush3.msra.mxu1 %v3915_v55  ;;  %3110 = vmatpush3.msra.mxu0 %v3915_v55 }
 0x8bc   :  { %3076 = vmatprep.subr.mxu1 %v3922_v22  ;;  %3111 = vmatprep.subr.mxu0 %v3922_v22 }
 0x8bd   :  { %3077 = vmatpush3.msra.mxu1 %v3922_v22  ;;  %3112 = vmatpush3.msra.mxu0 %v3922_v22 }
 0x8be   :  { %3078 = vmatprep.subr.mxu1 %v3930_v56  ;;  %3113 = vmatprep.subr.mxu0 %v3930_v56 }
 0x8bf   :  { %3079 = vmatpush3.msra.mxu1 %v3930_v56  ;;  %3114 = vmatpush3.msra.mxu0 %v3930_v56 }
 0x8c0   :  { %3080 = vmatprep.subr.mxu1 %v3982_v30  ;;  %3115 = vmatprep.subr.mxu0 %v3982_v30 }
 0x8c1   :  { %3081 = vmatpush3.msra.mxu1 %v3982_v30  ;;  %3116 = vmatpush3.msra.mxu0 %v3982_v30 }
 0x8c2   :  { %3082 = vmatprep.subr.mxu1 %v3989_v31  ;;  %3117 = vmatprep.subr.mxu0 %v3989_v31 }
 0x8c3   :  { %3083 = vmatpush3.msra.mxu1 %v3989_v31  ;;  %3118 = vmatpush3.msra.mxu0 %v3989_v31 }
 0x8c4   :  { %3084 = vmatprep.subr.mxu1 %v3996_v32  ;;  %3119 = vmatprep.subr.mxu0 %v3996_v32 }
 0x8c5   :  { %3085 = vmatpush3.msra.mxu1 %v3996_v32  ;;  %3120 = vmatpush3.msra.mxu0 %v3996_v32 }
 0x8c6   :  { %3086 = vmatprep.subr.mxu1 %v4003_v33  ;;  %3121 = vmatprep.subr.mxu0 %v4003_v33 }
 0x8c7   :  { %3087 = vmatpush3.msra.mxu1 %v4003_v33  ;;  %3122 = vmatpush3.msra.mxu0 %v4003_v33 }
 0x8c8   :  { %3088 = vmatprep.subr.mxu1 %v4010_v34  ;;  %3123 = vmatprep.subr.mxu0 %v4010_v34 }
 0x8c9   :  { %3089 = vmatpush3.msra.mxu1 %v4010_v34  ;;  %3124 = vmatpush3.msra.mxu0 %v4010_v34  ;;  %v2060_v34 = vpop.permute.xlu0 %2059 }
 0x8ca   :  { %3090 = vmatprep.subr.mxu1 %v4017_v35  ;;  %3125 = vmatprep.subr.mxu0 %v4017_v35 }
 0x8cb   :  { %3091 = vmatpush3.msra.mxu1 %v4017_v35  ;;  %3126 = vmatpush3.msra.mxu0 %v4017_v35 }
 0x8cc   :  { %3092 = vmatprep.subr.mxu1 %v4024_v36  ;;  %3127 = vmatprep.subr.mxu0 %v4024_v36 }
 0x8cd   :  { %3093 = vmatpush3.msra.mxu1 %v4024_v36  ;;  %3128 = vmatpush3.msra.mxu0 %v4024_v36  ;;  %v2074_v42 = vpop.permute.xlu0 %2073 }
 0x8ce   :  { %3132 = vmatprep.subr.mxu1 %v3734_v2  ;;  %3137 = vmatprep.subr.mxu0 %v3734_v2 }
 0x96a   :  { %v3050_v1 = vpop.f32.mrf.mxu0 }
 0x96b   :  { %v1749_v6 = vmul.f32 %v3050_v1, %v4034_v40 }
 0x96c   :  { %v1739_v5 = vpop.f32.mrf.mxu0 }
 0x96d   :  { %v1748_v9 = vmul.f32 %v1739_v5, %v4029_v37 }
 0x96e   :  { %v3055_v50 = vpop.f32.mrf.mxu1  ;;  %v1877_v52 = vpop.f32.mrf.mxu0 }
 0x96f   :  { %v1832_v53 = vadd.f32 %v3055_v50, %v1749_v6  ;;  %v1959_v54 = vmul.f32 %v1877_v52, %v1877_v52  ;;  %3094 = vmatprep.mubr.f32.mxu1 %v1877_v52 }
 0x970   :  { %v3060_v24 = vpop.f32.mrf.mxu0  ;;  %v1822_v62 = vpop.f32.mrf.mxu1 }
 0x971   :  { %3129 = vmatprep.mubr.f32.mxu0 %v1959_v54  ;;  %v1831_v13 = vadd.f32 %v1822_v62, %v1748_v9 }
 0x972   :  { %v1880_v55 = vpop.f32.mrf.mxu0 }
 0x973   :  { %v1960_v22 = vmul.f32 %v1880_v55, %v1880_v55  ;;  %3095 = vmatmul.mubr.f32.vlgmr.msra.gmra.mxu1 %v1880_v55 }
 0x974   :  { %v3061_v56 = vpop.f32.mrf.mxu0  ;;  %3133 = vmatpush3.msra.mxu1 %v3734_v2 }
 0x975   :  { %3130 = vmatmul.mubr.f32.vlgmr.msra.gmra.mxu0 %v1960_v22 }
 0x976   :  { %3138 = vmatpush3.msra.mxu0 %v3734_v2  ;;  %v2055_v2 = vpop.permute.xlu1 %2054 }
 0x97a   :  { %v2069_v41 = vpop.permute.xlu1 %2068 }
 0xa33   :  { %v3096_v21 = vpop.f32.mrf.mxu1 }
 0xa34   :  { %v2041_v63 = vmul.f32 0.015625, %v3096_v21 }
 0xa35   :  { %v1950_v0 = vpop.f32.mrf.mxu1  ;;  %v3131_v3 = vpop.f32.mrf.mxu0 }
 0xa36   :  { %v2045_v4 = vmul.f32 %v2041_v63, %v2041_v63  ;;  %v2040_v23 = vmul.f32 0.015625, %v1950_v0  ;;  %v2043_v25 = vmul.f32 0.015625, %v3131_v3 }
 0xa37   :  { %v2027_v26 = vpop.f32.mrf.mxu0 }
 0xa38   :  { %v2044_v27 = vmul.f32 %v2040_v23, %v2040_v23  ;;  %v2047_v28 = vsub.f32 %v2043_v25, %v2045_v4  ;;  %v2042_v29 = vmul.f32 0.015625, %v2027_v26 }
 0xa3a   :  { %v2049_v30 = vadd.f32 1e-05, %v2047_v28  ;;  %v2046_v31 = vsub.f32 %v2042_v29, %v2044_v27 }
 0xa3c   :  { %3162 = vrsqrt.f32 %v2049_v30  ;;  %v2048_v32 = vadd.f32 1e-05, %v2046_v31 }
 0xa3e   :  { %3164 = vrsqrt.f32 %v2048_v32 }
 0xa49   :  { %v3163_v33 = vpop.eup %3162 }
 0xa4a   :  { %v2063_v35 = vmul.f32 %v3163_v33, %v2060_v34 }
 0xa4b   :  { %v3165_v36 = vpop.eup %3164 }
 0xa4c   :  { %v2062_v38 = vmul.f32 %v3165_v36, %v2055_v2  ;;  %v2065_v39 = vmul.f32 %v2063_v35, %v2041_v63 }
 0xa4e   :  { %3134 = vmatprep.mubr.msk.f32.mxu1 %vm75_vm2, %v2062_v38  ;;  %v2064_v40 = vmul.f32 %v2062_v38, %v2040_v23  ;;  %v2077_v44 = vsub.f32 %v2074_v42, %v2065_v39 }
 0xa4f   :  { %3135 = vmatmul.mubr.msk.f32.vlgmr.msra.gmra.mxu1 %vm75_vm2, %v2063_v35 }
 0xa50   :  { %v2076_v43 = vsub.f32 %v2069_v41, %v2064_v40 }
 0xa52   :  { %3139 = vmatprep.mubr.msk.f32.mxu0 %vm75_vm2, %v2076_v43 }
 0xa53   :  { %3140 = vmatmul.mubr.msk.f32.vlgmr.msra.gmra.mxu0 %vm75_vm2, %v2077_v44 }
 0xb0f   :  { %v3136_v45 = vpop.f32.mrf.mxu1 }
 0xb10   :  { %v2160_v7 = vmul.f32 %v3136_v45, %v1880_v55 }
 0xb11   :  { %v2150_v47 = vpop.f32.mrf.mxu1 }
 0xb12   :  { %v2159_v10 = vmul.f32 %v2150_v47, %v1877_v52 }
 0xb13   :  { %v3141_v8 = vpop.f32.mrf.mxu0 }
 0xb14   :  { %v2243_v11 = vadd.f32 %v3141_v8, %v2160_v7 }
 0xb15   :  { %v2233_v12 = vpop.f32.mrf.mxu0 }
 0xb16   :  { %v2245_v48 = vadd.f32 %v2243_v11, %v1832_v53  ;;  %v2242_v49 = vadd.f32 %v2233_v12, %v2159_v10 }
 0xb18   :  { %2247 = vst [vmem:[#allocation2 + $0x8] sm:$0xff] %v2245_v48  ;;  %v2244_v51 = vadd.f32 %v2242_v49, %v1831_v13 }
 0xb1a   :  { %2246 = vst [vmem:[#allocation2] sm:$0xff] %v2244_v51 }
 0xb1b   :  { %3193 = shalt.err (!%p3190_p4)
}
 0xb1c   :  { %s3211_s11 = smov 128  }
 0xb1d   :  { %2259 = dma.vmem_to_hbm [thread:$0]  %s2254_s1, 256, %s4147_s16, [#allocation3], %s3211_s11, %s3211_s11, %s3208_s21  }
 0xb1e   :  { %3202 = dma.done.wait [#allocation3], 256  }
 0xb1f   :  { %3203 = vsyncadd [#allocation3], 4294967040 }
 0xb20   :  { %2263 = vsyncpa [#allocation3], 1 }

</bundles_post_ra>
